<compile_context>
chip_gen: v5e
topology: v5e:2x2
jax: 0.10.0
libtpu: 0.0.40
codegen_flags: <defaults>
</compile_context>

<pallas_src>
import functools

import jax
import jax.numpy as jnp
from jax.experimental import pallas as pl
from jax.experimental.pallas import tpu as pltpu


def _identity_copy_kernel(x_ref, o_ref):
    # DeepLab.forward(x) == x: each grid step streams one lane-dense tile.
    o_ref[...] = x_ref[...]


_LANE_CANDIDATES = (8192, 4096, 2048, 1024, 512, 256, 128)
_TARGET_TILE_BYTES = 4 << 20   # ~4 MiB tiles amortize per-step pipeline overhead
_VMEM_LIMIT_BYTES = 32 << 20   # 2x(in)+2x(out) 4 MiB buffers = 16 MiB << 32 MiB
_MIN_TILE_ROWS = 32            # dtype-safe sublane multiple (int8 packs (32,128))
_MIN_GRID_STEPS = 8            # keep both v7x TCs busy + double-buffering live


def _choose_lane(total):
    """Largest lane-dense (multiple-of-128) last dim that divides `total`."""
    for cand in _LANE_CANDIDATES:
        if total % cand == 0:
            return cand
    return None


@functools.partial(
    jax.jit,
    static_argnames=("rows", "lane", "tile_r"),
    donate_argnums=(0,),
)
def _tiled_identity(x, *, rows, lane, tile_r):
    orig_shape = x.shape
    # Contiguous reshape: metadata-only under jit, no extra HBM traffic.
    x2d = x.reshape(rows, lane)
    grid = (pl.cdiv(rows, tile_r),)  # partial last block handled by Pallas
    out2d = pl.pallas_call(
        _identity_copy_kernel,
        out_shape=jax.ShapeDtypeStruct((rows, lane), x.dtype),
        grid_spec=pl.GridSpec(
            grid=grid,
            in_specs=[pl.BlockSpec((tile_r, lane), lambda i: (i, 0))],
            out_specs=pl.BlockSpec((tile_r, lane), lambda i: (i, 0)),
        ),
        # Identity op: alias the output onto the donated input buffer so no
        # second full-size HBM allocation is needed.
        input_output_aliases={0: 0},
        compiler_params=pltpu.CompilerParams(
            dimension_semantics=("parallel",),
            vmem_limit_bytes=_VMEM_LIMIT_BYTES,
        ),
    )(x2d)
    return out2d.reshape(orig_shape)


def deeplab_forward(x):
    """Pallas implementation of DeepLab.forward (identity).

    Returns an array with identical shape/dtype/values to `x`.  NOTE: when the
    tiled kernel path is taken, `x`'s buffer is donated -- callers must not
    reuse `x` afterwards.
    """
    total = 1
    for d in x.shape:
        total *= int(d)
    if total == 0:
        return x

    lane = _choose_lane(total)
    if lane is None:
        # Not 128-divisible: forward is `return x`, so returning x untouched
        # is exact and strictly cheaper than any padded copy kernel.
        return x

    rows = total // lane
    itemsize = jnp.dtype(x.dtype).itemsize
    tile_r = max(
        _MIN_TILE_ROWS,
        (_TARGET_TILE_BYTES // (lane * itemsize)) // _MIN_TILE_ROWS * _MIN_TILE_ROWS,
    )

    if rows <= tile_r:
        # Single block: a pallas_call would be pure custom-call + DMA overhead
        # for an identity op -> short-circuit.
        return x

    # Keep the grid deep enough so both v7x TensorCores get work and the
    # pipeline still overlaps after enlarging the tiles.
    num_blocks = pl.cdiv(rows, tile_r)
    if num_blocks < _MIN_GRID_STEPS:
        shrunk = pl.cdiv(pl.cdiv(rows, _MIN_GRID_STEPS), _MIN_TILE_ROWS) * _MIN_TILE_ROWS
        tile_r = max(_MIN_TILE_ROWS, min(tile_r, shrunk))

    return _tiled_identity(x, rows=rows, lane=lane, tile_r=tile_r)


if __name__ == "__main__":
    key = jax.random.PRNGKey(0)
    k1, k2 = jax.random.split(key)

    # 1) Tiny NCHW input (module's nominal small shape): hits the
    #    single-block identity shortcut.
    x_small = jax.random.normal(k1, (2, 4, 16, 16), dtype=jnp.float32)
    x_small_ref = jax.block_until_ready(jnp.copy(x_small))
    y_small = jax.block_until_ready(deeplab_forward(x_small))
    assert y_small.shape == x_small_ref.shape and y_small.dtype == x_small_ref.dtype
    assert bool(jnp.array_equal(y_small, x_small_ref))

    # 2) Modest activation-sized NCHW input: exercises the tiled, pipelined,
    #    lane-dense Pallas copy path (donated input + aliased output).
    x_big = jax.random.normal(k2, (2, 4, 512, 512), dtype=jnp.float32)
    x_big_ref = jax.block_until_ready(jnp.copy(x_big))
    y_big = jax.block_until_ready(deeplab_forward(x_big))
    assert y_big.shape == x_big_ref.shape and y_big.dtype == x_big_ref.dtype
    assert bool(jnp.array_equal(y_big, x_big_ref))

    print("KERNEL_OK")
</pallas_src>

<mosaic_0001>
module attributes {stable_mosaic.version = 11 : i64} {
  func.func @_identity_copy_kernel(%arg0: i32, %arg1: memref<32x8192xf32, #tpu.memory_space<vmem>>, %arg2: memref<32x8192xf32, #tpu.memory_space<vmem>>) attributes {dimension_semantics = [#tpu.dimension_semantics<parallel>], iteration_bounds = array<i64: 8>, scalar_prefetch = 0 : i64, scratch_operands = 0 : i64, tpu.core_type = #tpu.core_type<tc>, window_params = [{transform_indices = @transform_0, window_bounds = array<i64: 32, 8192>}, {transform_indices = @transform_1, window_bounds = array<i64: 32, 8192>}]} {
    %c0 = arith.constant 0 : index
    %c0_0 = arith.constant 0 : index
    %0 = vector.load %arg1[%c0, %c0_0] : memref<32x8192xf32, #tpu.memory_space<vmem>>, vector<32x8192xf32>
    %c0_1 = arith.constant 0 : index
    %c0_2 = arith.constant 0 : index
    %1 = vector.load %arg2[%c0_1, %c0_2] : memref<32x8192xf32, #tpu.memory_space<vmem>>, vector<32x8192xf32>
    tpu.vector_store %arg2[%c0_1, %c0_2], %0 {strides = array<i32>} : memref<32x8192xf32, #tpu.memory_space<vmem>>, vector<32x8192xf32>,
    return
  }
  func.func @transform_0(%arg0: i32) -> (i32, i32) {
    %c0_i32 = arith.constant 0 : i32
    %c0_i32_0 = arith.constant 0 : i32
    return %arg0, %c0_i32 : i32, i32
  }
  func.func @transform_1(%arg0: i32) -> (i32, i32) {
    %c0_i32 = arith.constant 0 : i32
    %c0_i32_0 = arith.constant 0 : i32
    return %arg0, %c0_i32 : i32, i32
  }
}

</mosaic_0001>

<bundles_post_ra>
// kernel: _tiled_identity.1
= control target key start
LH: loop header
LB: loop body
LE: loop exit
PB: predicated region body
PF: predicated region fallthrough
CT: control target
= control target key end

     0   :  { %s736_s6 = smov 0   ;;  %s2044_s0 = inlined_call_operand.vmem [shape: f32[256,8192], index: 0, kind: input, shape index: {}, may-alias: {0,1}]   ;;  %s2045_s1 = inlined_call_operand.vmem [shape: f32[256,8192], index: 1, kind: output, shape index: {}, may-alias: {0,1}]  }
   0x1 LB: > { %s695_s7 = sadd.s32 4294967295, %s724_s6   ;;  %p699_p0 = scmp.ge.s32.totalorder %s724_s6, 1  ;;  %s724_s6 = sphi %s736_s6, %s11_s6  }
   0x2   : > { %p89_p1 = scmp.lt.s32.totalorder %s724_s6, 9 }
   0x4   : > { %p90_p2 = pnand %p699_p0, %p89_p1 }
   0x6   : > { %93 = sbr.rel (%p90_p2) target bundleno = 484 (0x1e4), region = 24 }
   0xb   : > { %s700_s8 = sshll.u32 %s695_s7, 2 }
   0xc   : > { %p112_p3 = scmp.lt.s32.totalorder %s700_s8, 31 }
   0xe   : > { %s2431_s8 = smov (!%p112_p3, %s700_s8), 31 }
   0xf   : > { %s708_s9 = sshll.u32 %s2431_s8, 9 }
  0x10   : > { %s752_s12 = scalar_lea.vmem %s2044_s0, %s708_s9  ;;  %s1506_s15 = scalar_lea.vmem %s2045_s1, %s708_s9 }
  0x11   : > { %v755_v0 = vld [vmem:[%s752_s12] sm:$0xff]  ;;  %v758_v1 = vld [vmem:[%s752_s12 + $0x8] sm:$0xff]  ;;  %v761_v2 = vld [vmem:[%s752_s12 + $0x10] sm:$0xff] }
  0x12   : > { %v764_v3 = vld [vmem:[%s752_s12 + $0x18] sm:$0xff]  ;;  %v767_v4 = vld [vmem:[%s752_s12 + $0x20] sm:$0xff]  ;;  %v770_v5 = vld [vmem:[%s752_s12 + $0x28] sm:$0xff] }
  0x13   : > { %v773_v6 = vld [vmem:[%s752_s12 + $0x30] sm:$0xff]  ;;  %v776_v7 = vld [vmem:[%s752_s12 + $0x38] sm:$0xff]  ;;  %v779_v8 = vld [vmem:[%s752_s12 + $0x40] sm:$0xff] }
  0x14   : > { %v782_v9 = vld [vmem:[%s752_s12 + $0x48] sm:$0xff]  ;;  %v785_v10 = vld [vmem:[%s752_s12 + $0x50] sm:$0xff]  ;;  %v788_v11 = vld [vmem:[%s752_s12 + $0x58] sm:$0xff] }
  0x15   : > { %v791_v12 = vld [vmem:[%s752_s12 + $0x60] sm:$0xff]  ;;  %v794_v13 = vld [vmem:[%s752_s12 + $0x68] sm:$0xff]  ;;  %v797_v14 = vld [vmem:[%s752_s12 + $0x70] sm:$0xff] }
  0x16   : > { %v800_v15 = vld [vmem:[%s752_s12 + $0x78] sm:$0xff]  ;;  %v803_v16 = vld [vmem:[%s752_s12 + $0x80] sm:$0xff]  ;;  %v806_v17 = vld [vmem:[%s752_s12 + $0x88] sm:$0xff] }
  0x17   : > { %v809_v18 = vld [vmem:[%s752_s12 + $0x90] sm:$0xff]  ;;  %v812_v19 = vld [vmem:[%s752_s12 + $0x98] sm:$0xff]  ;;  %v815_v20 = vld [vmem:[%s752_s12 + $0xa0] sm:$0xff] }
  0x18   : > { %v818_v21 = vld [vmem:[%s752_s12 + $0xa8] sm:$0xff]  ;;  %v821_v22 = vld [vmem:[%s752_s12 + $0xb0] sm:$0xff]  ;;  %v824_v23 = vld [vmem:[%s752_s12 + $0xb8] sm:$0xff] }
  0x19   : > { %v827_v24 = vld [vmem:[%s752_s12 + $0xc0] sm:$0xff]  ;;  %v830_v25 = vld [vmem:[%s752_s12 + $0xc8] sm:$0xff]  ;;  %v833_v26 = vld [vmem:[%s752_s12 + $0xd0] sm:$0xff] }
  0x1a   : > { %v836_v27 = vld [vmem:[%s752_s12 + $0xd8] sm:$0xff]  ;;  %v839_v28 = vld [vmem:[%s752_s12 + $0xe0] sm:$0xff]  ;;  %v842_v29 = vld [vmem:[%s752_s12 + $0xe8] sm:$0xff] }
  0x1b   : > { %v845_v30 = vld [vmem:[%s752_s12 + $0xf0] sm:$0xff]  ;;  %v848_v31 = vld [vmem:[%s752_s12 + $0xf8] sm:$0xff]  ;;  %v851_v32 = vld [vmem:[%s752_s12 + $0x100] sm:$0xff] }
  0x1c   : > { %v854_v33 = vld [vmem:[%s752_s12 + $0x108] sm:$0xff]  ;;  %v857_v34 = vld [vmem:[%s752_s12 + $0x110] sm:$0xff]  ;;  %v860_v35 = vld [vmem:[%s752_s12 + $0x118] sm:$0xff] }
  0x1d   : > { %v863_v36 = vld [vmem:[%s752_s12 + $0x120] sm:$0xff]  ;;  %v866_v37 = vld [vmem:[%s752_s12 + $0x128] sm:$0xff]  ;;  %v869_v38 = vld [vmem:[%s752_s12 + $0x130] sm:$0xff] }
  0x1e   : > { %v872_v39 = vld [vmem:[%s752_s12 + $0x138] sm:$0xff]  ;;  %v875_v40 = vld [vmem:[%s752_s12 + $0x140] sm:$0xff]  ;;  %v878_v41 = vld [vmem:[%s752_s12 + $0x148] sm:$0xff] }
  0x1f   : > { %v881_v42 = vld [vmem:[%s752_s12 + $0x150] sm:$0xff]  ;;  %v884_v43 = vld [vmem:[%s752_s12 + $0x158] sm:$0xff]  ;;  %v887_v44 = vld [vmem:[%s752_s12 + $0x160] sm:$0xff] }
  0x20   : > { %v890_v45 = vld [vmem:[%s752_s12 + $0x168] sm:$0xff]  ;;  %v893_v46 = vld [vmem:[%s752_s12 + $0x170] sm:$0xff]  ;;  %v896_v47 = vld [vmem:[%s752_s12 + $0x178] sm:$0xff] }
  0x21   : > { %v899_v48 = vld [vmem:[%s752_s12 + $0x180] sm:$0xff]  ;;  %v902_v49 = vld [vmem:[%s752_s12 + $0x188] sm:$0xff]  ;;  %v905_v50 = vld [vmem:[%s752_s12 + $0x190] sm:$0xff] }
  0x22   : > { %v908_v51 = vld [vmem:[%s752_s12 + $0x198] sm:$0xff]  ;;  %v911_v52 = vld [vmem:[%s752_s12 + $0x1a0] sm:$0xff]  ;;  %v914_v53 = vld [vmem:[%s752_s12 + $0x1a8] sm:$0xff] }
  0x23   : > { %v917_v54 = vld [vmem:[%s752_s12 + $0x1b0] sm:$0xff]  ;;  %v920_v55 = vld [vmem:[%s752_s12 + $0x1b8] sm:$0xff]  ;;  %v923_v56 = vld [vmem:[%s752_s12 + $0x1c0] sm:$0xff] }
  0x24   : > { %2046 = vst [vmem:[#allocation2_spill] sm:$0xff] %v917_v54  ;;  %v926_v57 = vld [vmem:[%s752_s12 + $0x1c8] sm:$0xff]  ;;  %v929_v58 = vld [vmem:[%s752_s12 + $0x1d0] sm:$0xff]  ;;  %v932_v59 = vld [vmem:[%s752_s12 + $0x1d8] sm:$0xff] }
  0x25   : > { %2047 = vst [vmem:[#allocation3_spill] sm:$0xff] %v920_v55  ;;  %v935_v60 = vld [vmem:[%s752_s12 + $0x1e0] sm:$0xff]  ;;  %v938_v61 = vld [vmem:[%s752_s12 + $0x1e8] sm:$0xff]  ;;  %v941_v62 = vld [vmem:[%s752_s12 + $0x1f0] sm:$0xff] }
  0x26   : > { %2048 = vst [vmem:[#allocation4_spill] sm:$0xff] %v923_v56  ;;  %v944_v63 = vld [vmem:[%s752_s12 + $0x1f8] sm:$0xff]  ;;  %v1481_v56 = vld [vmem:[%s752_s12 + $0x790] sm:$0xff]  ;;  %v1490_v55 = vld [vmem:[%s752_s12 + $0x7a8] sm:$0xff] }
  0x27   : > { %2049 = vst [vmem:[#allocation5_spill] sm:$0xff] %v926_v57  ;;  %v947_v57 = vld [vmem:[%s752_s12 + $0x200] sm:$0xff] }
  0x28   : > { %2050 = vst [vmem:[#allocation6_spill] sm:$0xff] %v929_v58  ;;  %v950_v58 = vld [vmem:[%s752_s12 + $0x208] sm:$0xff]  ;;  %v1499_v54 = vld [vmem:[%s752_s12 + $0x7c0] sm:$0xff] }
  0x29   : > { %2051 = vst [vmem:[#allocation7_spill] sm:$0xff] %v932_v59  ;;  %v953_v59 = vld [vmem:[%s752_s12 + $0x210] sm:$0xff] }
  0x2a   : > { %2052 = vst [vmem:[#allocation8_spill] sm:$0xff] %v935_v60  ;;  %v956_v60 = vld [vmem:[%s752_s12 + $0x218] sm:$0xff] }
  0x2b   : > { %2053 = vst [vmem:[#allocation9_spill] sm:$0xff] %v938_v61  ;;  %v959_v61 = vld [vmem:[%s752_s12 + $0x220] sm:$0xff] }
  0x2c   : > { %2054 = vst [vmem:[#allocation10_spill] sm:$0xff] %v941_v62  ;;  %v962_v62 = vld [vmem:[%s752_s12 + $0x228] sm:$0xff] }
  0x2d   : > { %2055 = vst [vmem:[#allocation11_spill] sm:$0xff] %v944_v63  ;;  %v965_v63 = vld [vmem:[%s752_s12 + $0x230] sm:$0xff] }
  0x2e   : > { %2056 = vst [vmem:[#allocation12_spill] sm:$0xff] %v947_v57  ;;  %v968_v57 = vld [vmem:[%s752_s12 + $0x238] sm:$0xff] }
  0x2f   : > { %2057 = vst [vmem:[#allocation13_spill] sm:$0xff] %v950_v58  ;;  %v971_v58 = vld [vmem:[%s752_s12 + $0x240] sm:$0xff] }
  0x30   : > { %2058 = vst [vmem:[#allocation14_spill] sm:$0xff] %v953_v59  ;;  %v974_v59 = vld [vmem:[%s752_s12 + $0x248] sm:$0xff] }
  0x31   : > { %2059 = vst [vmem:[#allocation15_spill] sm:$0xff] %v956_v60  ;;  %v977_v60 = vld [vmem:[%s752_s12 + $0x250] sm:$0xff] }
  0x32   : > { %2060 = vst [vmem:[#allocation16_spill] sm:$0xff] %v959_v61  ;;  %v980_v61 = vld [vmem:[%s752_s12 + $0x258] sm:$0xff] }
  0x33   : > { %2061 = vst [vmem:[#allocation17_spill] sm:$0xff] %v962_v62  ;;  %v983_v62 = vld [vmem:[%s752_s12 + $0x260] sm:$0xff] }
  0x34   : > { %2062 = vst [vmem:[#allocation18_spill] sm:$0xff] %v965_v63  ;;  %v986_v63 = vld [vmem:[%s752_s12 + $0x268] sm:$0xff] }
  0x35   : > { %2063 = vst [vmem:[#allocation19_spill] sm:$0xff] %v968_v57  ;;  %v989_v57 = vld [vmem:[%s752_s12 + $0x270] sm:$0xff] }
  0x36   : > { %2064 = vst [vmem:[#allocation20_spill] sm:$0xff] %v971_v58  ;;  %v992_v58 = vld [vmem:[%s752_s12 + $0x278] sm:$0xff] }
  0x37   : > { %2065 = vst [vmem:[#allocation21_spill] sm:$0xff] %v974_v59  ;;  %v995_v59 = vld [vmem:[%s752_s12 + $0x280] sm:$0xff] }
  0x38   : > { %2066 = vst [vmem:[#allocation22_spill] sm:$0xff] %v977_v60  ;;  %v998_v60 = vld [vmem:[%s752_s12 + $0x288] sm:$0xff] }
  0x39   : > { %2067 = vst [vmem:[#allocation23_spill] sm:$0xff] %v980_v61  ;;  %v1001_v61 = vld [vmem:[%s752_s12 + $0x290] sm:$0xff] }
  0x3a   : > { %2068 = vst [vmem:[#allocation24_spill] sm:$0xff] %v983_v62  ;;  %v1004_v62 = vld [vmem:[%s752_s12 + $0x298] sm:$0xff] }
  0x3b   : > { %2069 = vst [vmem:[#allocation25_spill] sm:$0xff] %v986_v63  ;;  %v1007_v63 = vld [vmem:[%s752_s12 + $0x2a0] sm:$0xff] }
  0x3c   : > { %2070 = vst [vmem:[#allocation26_spill] sm:$0xff] %v989_v57  ;;  %v1010_v57 = vld [vmem:[%s752_s12 + $0x2a8] sm:$0xff] }
  0x3d   : > { %2071 = vst [vmem:[#allocation27_spill] sm:$0xff] %v992_v58  ;;  %v1013_v58 = vld [vmem:[%s752_s12 + $0x2b0] sm:$0xff] }
  0x3e   : > { %2072 = vst [vmem:[#allocation28_spill] sm:$0xff] %v995_v59  ;;  %v1016_v59 = vld [vmem:[%s752_s12 + $0x2b8] sm:$0xff] }
  0x3f   : > { %2073 = vst [vmem:[#allocation29_spill] sm:$0xff] %v998_v60  ;;  %v1019_v60 = vld [vmem:[%s752_s12 + $0x2c0] sm:$0xff] }
  0x40   : > { %2074 = vst [vmem:[#allocation30_spill] sm:$0xff] %v1001_v61  ;;  %v1022_v61 = vld [vmem:[%s752_s12 + $0x2c8] sm:$0xff] }
  0x41   : > { %2075 = vst [vmem:[#allocation31_spill] sm:$0xff] %v1004_v62  ;;  %v1025_v62 = vld [vmem:[%s752_s12 + $0x2d0] sm:$0xff] }
  0x42   : > { %2076 = vst [vmem:[#allocation32_spill] sm:$0xff] %v1007_v63  ;;  %v1028_v63 = vld [vmem:[%s752_s12 + $0x2d8] sm:$0xff] }
  0x43   : > { %2077 = vst [vmem:[#allocation33_spill] sm:$0xff] %v1010_v57  ;;  %v1031_v57 = vld [vmem:[%s752_s12 + $0x2e0] sm:$0xff] }
  0x44   : > { %2078 = vst [vmem:[#allocation34_spill] sm:$0xff] %v1013_v58  ;;  %v1034_v58 = vld [vmem:[%s752_s12 + $0x2e8] sm:$0xff] }
  0x45   : > { %2079 = vst [vmem:[#allocation35_spill] sm:$0xff] %v1016_v59  ;;  %v1037_v59 = vld [vmem:[%s752_s12 + $0x2f0] sm:$0xff] }
  0x46   : > { %2080 = vst [vmem:[#allocation36_spill] sm:$0xff] %v1019_v60  ;;  %v1040_v60 = vld [vmem:[%s752_s12 + $0x2f8] sm:$0xff] }
  0x47   : > { %2081 = vst [vmem:[#allocation37_spill] sm:$0xff] %v1022_v61  ;;  %v1043_v61 = vld [vmem:[%s752_s12 + $0x300] sm:$0xff] }
  0x48   : > { %2082 = vst [vmem:[#allocation38_spill] sm:$0xff] %v1025_v62  ;;  %v1046_v62 = vld [vmem:[%s752_s12 + $0x308] sm:$0xff] }
  0x49   : > { %2083 = vst [vmem:[#allocation39_spill] sm:$0xff] %v1028_v63  ;;  %v1049_v63 = vld [vmem:[%s752_s12 + $0x310] sm:$0xff] }
  0x4a   : > { %2084 = vst [vmem:[#allocation40_spill] sm:$0xff] %v1031_v57  ;;  %v1052_v57 = vld [vmem:[%s752_s12 + $0x318] sm:$0xff] }
  0x4b   : > { %2085 = vst [vmem:[#allocation41_spill] sm:$0xff] %v1034_v58  ;;  %v1055_v58 = vld [vmem:[%s752_s12 + $0x320] sm:$0xff] }
  0x4c   : > { %2086 = vst [vmem:[#allocation42_spill] sm:$0xff] %v1037_v59  ;;  %v1058_v59 = vld [vmem:[%s752_s12 + $0x328] sm:$0xff] }
  0x4d   : > { %2087 = vst [vmem:[#allocation43_spill] sm:$0xff] %v1040_v60  ;;  %v1061_v60 = vld [vmem:[%s752_s12 + $0x330] sm:$0xff] }
  0x4e   : > { %2088 = vst [vmem:[#allocation44_spill] sm:$0xff] %v1043_v61  ;;  %v1064_v61 = vld [vmem:[%s752_s12 + $0x338] sm:$0xff] }
  0x4f   : > { %2089 = vst [vmem:[#allocation45_spill] sm:$0xff] %v1046_v62  ;;  %v1067_v62 = vld [vmem:[%s752_s12 + $0x340] sm:$0xff] }
  0x50   : > { %2090 = vst [vmem:[#allocation46_spill] sm:$0xff] %v1049_v63  ;;  %v1070_v63 = vld [vmem:[%s752_s12 + $0x348] sm:$0xff] }
  0x51   : > { %2091 = vst [vmem:[#allocation47_spill] sm:$0xff] %v1052_v57  ;;  %v1073_v57 = vld [vmem:[%s752_s12 + $0x350] sm:$0xff] }
  0x52   : > { %2092 = vst [vmem:[#allocation48_spill] sm:$0xff] %v1055_v58  ;;  %v1076_v58 = vld [vmem:[%s752_s12 + $0x358] sm:$0xff] }
  0x53   : > { %2093 = vst [vmem:[#allocation49_spill] sm:$0xff] %v1058_v59  ;;  %v1079_v59 = vld [vmem:[%s752_s12 + $0x360] sm:$0xff] }
  0x54   : > { %2094 = vst [vmem:[#allocation50_spill] sm:$0xff] %v1061_v60  ;;  %v1082_v60 = vld [vmem:[%s752_s12 + $0x368] sm:$0xff] }
  0x55   : > { %2095 = vst [vmem:[#allocation51_spill] sm:$0xff] %v1064_v61  ;;  %v1085_v61 = vld [vmem:[%s752_s12 + $0x370] sm:$0xff] }
  0x56   : > { %2096 = vst [vmem:[#allocation52_spill] sm:$0xff] %v1067_v62  ;;  %v1088_v62 = vld [vmem:[%s752_s12 + $0x378] sm:$0xff] }
  0x57   : > { %2097 = vst [vmem:[#allocation53_spill] sm:$0xff] %v1070_v63  ;;  %v1091_v63 = vld [vmem:[%s752_s12 + $0x380] sm:$0xff] }
  0x58   : > { %2098 = vst [vmem:[#allocation54_spill] sm:$0xff] %v1073_v57  ;;  %v1094_v57 = vld [vmem:[%s752_s12 + $0x388] sm:$0xff] }
  0x59   : > { %2099 = vst [vmem:[#allocation55_spill] sm:$0xff] %v1076_v58  ;;  %v1097_v58 = vld [vmem:[%s752_s12 + $0x390] sm:$0xff] }
  0x5a   : > { %2100 = vst [vmem:[#allocation56_spill] sm:$0xff] %v1079_v59  ;;  %v1100_v59 = vld [vmem:[%s752_s12 + $0x398] sm:$0xff] }
  0x5b   : > { %2101 = vst [vmem:[#allocation57_spill] sm:$0xff] %v1082_v60  ;;  %v1103_v60 = vld [vmem:[%s752_s12 + $0x3a0] sm:$0xff] }
  0x5c   : > { %2102 = vst [vmem:[#allocation58_spill] sm:$0xff] %v1085_v61  ;;  %v1106_v61 = vld [vmem:[%s752_s12 + $0x3a8] sm:$0xff] }
  0x5d   : > { %2103 = vst [vmem:[#allocation59_spill] sm:$0xff] %v1088_v62  ;;  %v1109_v62 = vld [vmem:[%s752_s12 + $0x3b0] sm:$0xff] }
  0x5e   : > { %2104 = vst [vmem:[#allocation60_spill] sm:$0xff] %v1091_v63  ;;  %v1112_v63 = vld [vmem:[%s752_s12 + $0x3b8] sm:$0xff] }
  0x5f   : > { %2105 = vst [vmem:[#allocation61_spill] sm:$0xff] %v1094_v57  ;;  %v1115_v57 = vld [vmem:[%s752_s12 + $0x3c0] sm:$0xff] }
  0x60   : > { %2106 = vst [vmem:[#allocation62_spill] sm:$0xff] %v1097_v58  ;;  %v1118_v58 = vld [vmem:[%s752_s12 + $0x3c8] sm:$0xff] }
  0x61   : > { %2107 = vst [vmem:[#allocation63_spill] sm:$0xff] %v1100_v59  ;;  %v1121_v59 = vld [vmem:[%s752_s12 + $0x3d0] sm:$0xff] }
  0x62   : > { %2108 = vst [vmem:[#allocation64_spill] sm:$0xff] %v1103_v60  ;;  %v1124_v60 = vld [vmem:[%s752_s12 + $0x3d8] sm:$0xff] }
  0x63   : > { %2109 = vst [vmem:[#allocation65_spill] sm:$0xff] %v1106_v61  ;;  %v1127_v61 = vld [vmem:[%s752_s12 + $0x3e0] sm:$0xff] }
  0x64   : > { %2110 = vst [vmem:[#allocation66_spill] sm:$0xff] %v1109_v62  ;;  %v1130_v62 = vld [vmem:[%s752_s12 + $0x3e8] sm:$0xff] }
  0x65   : > { %2111 = vst [vmem:[#allocation67_spill] sm:$0xff] %v1112_v63  ;;  %v1133_v63 = vld [vmem:[%s752_s12 + $0x3f0] sm:$0xff] }
  0x66   : > { %2112 = vst [vmem:[#allocation68_spill] sm:$0xff] %v1115_v57  ;;  %v1136_v57 = vld [vmem:[%s752_s12 + $0x3f8] sm:$0xff] }
  0x67   : > { %2113 = vst [vmem:[#allocation69_spill] sm:$0xff] %v1118_v58  ;;  %v1139_v58 = vld [vmem:[%s752_s12 + $0x400] sm:$0xff] }
  0x68   : > { %2114 = vst [vmem:[#allocation70_spill] sm:$0xff] %v1121_v59  ;;  %v1142_v59 = vld [vmem:[%s752_s12 + $0x408] sm:$0xff] }
  0x69   : > { %2115 = vst [vmem:[#allocation71_spill] sm:$0xff] %v1124_v60  ;;  %v1145_v60 = vld [vmem:[%s752_s12 + $0x410] sm:$0xff] }
  0x6a   : > { %2116 = vst [vmem:[#allocation72_spill] sm:$0xff] %v1127_v61  ;;  %v1148_v61 = vld [vmem:[%s752_s12 + $0x418] sm:$0xff] }
  0x6b   : > { %2117 = vst [vmem:[#allocation73_spill] sm:$0xff] %v1130_v62  ;;  %v1151_v62 = vld [vmem:[%s752_s12 + $0x420] sm:$0xff] }
  0x6c   : > { %2118 = vst [vmem:[#allocation74_spill] sm:$0xff] %v1133_v63  ;;  %v1154_v63 = vld [vmem:[%s752_s12 + $0x428] sm:$0xff] }
  0x6d   : > { %2119 = vst [vmem:[#allocation75_spill] sm:$0xff] %v1136_v57  ;;  %v1157_v57 = vld [vmem:[%s752_s12 + $0x430] sm:$0xff] }
  0x6e   : > { %2120 = vst [vmem:[#allocation76_spill] sm:$0xff] %v1139_v58  ;;  %v1160_v58 = vld [vmem:[%s752_s12 + $0x438] sm:$0xff] }
  0x6f   : > { %2121 = vst [vmem:[#allocation77_spill] sm:$0xff] %v1142_v59  ;;  %v1163_v59 = vld [vmem:[%s752_s12 + $0x440] sm:$0xff] }
  0x70   : > { %2122 = vst [vmem:[#allocation78_spill] sm:$0xff] %v1145_v60  ;;  %v1166_v60 = vld [vmem:[%s752_s12 + $0x448] sm:$0xff] }
  0x71   : > { %2123 = vst [vmem:[#allocation79_spill] sm:$0xff] %v1148_v61  ;;  %v1169_v61 = vld [vmem:[%s752_s12 + $0x450] sm:$0xff] }
  0x72   : > { %2124 = vst [vmem:[#allocation80_spill] sm:$0xff] %v1151_v62  ;;  %v1172_v62 = vld [vmem:[%s752_s12 + $0x458] sm:$0xff] }
  0x73   : > { %2125 = vst [vmem:[#allocation81_spill] sm:$0xff] %v1154_v63  ;;  %v1175_v63 = vld [vmem:[%s752_s12 + $0x460] sm:$0xff] }
  0x74   : > { %2126 = vst [vmem:[#allocation82_spill] sm:$0xff] %v1157_v57  ;;  %v1178_v57 = vld [vmem:[%s752_s12 + $0x468] sm:$0xff] }
  0x75   : > { %2127 = vst [vmem:[#allocation83_spill] sm:$0xff] %v1160_v58  ;;  %v1181_v58 = vld [vmem:[%s752_s12 + $0x470] sm:$0xff] }
  0x76   : > { %2128 = vst [vmem:[#allocation84_spill] sm:$0xff] %v1163_v59  ;;  %v1184_v59 = vld [vmem:[%s752_s12 + $0x478] sm:$0xff] }
  0x77   : > { %2129 = vst [vmem:[#allocation85_spill] sm:$0xff] %v1166_v60  ;;  %v1187_v60 = vld [vmem:[%s752_s12 + $0x480] sm:$0xff] }
  0x78   : > { %2130 = vst [vmem:[#allocation86_spill] sm:$0xff] %v1169_v61  ;;  %v1190_v61 = vld [vmem:[%s752_s12 + $0x488] sm:$0xff] }
  0x79   : > { %2131 = vst [vmem:[#allocation87_spill] sm:$0xff] %v1172_v62  ;;  %v1193_v62 = vld [vmem:[%s752_s12 + $0x490] sm:$0xff] }
  0x7a   : > { %2132 = vst [vmem:[#allocation88_spill] sm:$0xff] %v1175_v63  ;;  %v1196_v63 = vld [vmem:[%s752_s12 + $0x498] sm:$0xff] }
  0x7b   : > { %2133 = vst [vmem:[#allocation89_spill] sm:$0xff] %v1178_v57  ;;  %v1199_v57 = vld [vmem:[%s752_s12 + $0x4a0] sm:$0xff] }
  0x7c   : > { %2134 = vst [vmem:[#allocation90_spill] sm:$0xff] %v1181_v58  ;;  %v1202_v58 = vld [vmem:[%s752_s12 + $0x4a8] sm:$0xff] }
  0x7d   : > { %2135 = vst [vmem:[#allocation91_spill] sm:$0xff] %v1184_v59  ;;  %v1205_v59 = vld [vmem:[%s752_s12 + $0x4b0] sm:$0xff] }
  0x7e   : > { %2136 = vst [vmem:[#allocation92_spill] sm:$0xff] %v1187_v60  ;;  %v1208_v60 = vld [vmem:[%s752_s12 + $0x4b8] sm:$0xff] }
  0x7f   : > { %2137 = vst [vmem:[#allocation93_spill] sm:$0xff] %v1190_v61  ;;  %v1211_v61 = vld [vmem:[%s752_s12 + $0x4c0] sm:$0xff] }
  0x80   : > { %2138 = vst [vmem:[#allocation94_spill] sm:$0xff] %v1193_v62  ;;  %v1214_v62 = vld [vmem:[%s752_s12 + $0x4c8] sm:$0xff] }
  0x81   : > { %2139 = vst [vmem:[#allocation95_spill] sm:$0xff] %v1196_v63  ;;  %v1217_v63 = vld [vmem:[%s752_s12 + $0x4d0] sm:$0xff] }
  0x82   : > { %2140 = vst [vmem:[#allocation96_spill] sm:$0xff] %v1199_v57  ;;  %v1220_v57 = vld [vmem:[%s752_s12 + $0x4d8] sm:$0xff] }
  0x83   : > { %2141 = vst [vmem:[#allocation97_spill] sm:$0xff] %v1202_v58  ;;  %v1223_v58 = vld [vmem:[%s752_s12 + $0x4e0] sm:$0xff] }
  0x84   : > { %2142 = vst [vmem:[#allocation98_spill] sm:$0xff] %v1205_v59  ;;  %v1226_v59 = vld [vmem:[%s752_s12 + $0x4e8] sm:$0xff] }
  0x85   : > { %2143 = vst [vmem:[#allocation99_spill] sm:$0xff] %v1208_v60  ;;  %v1229_v60 = vld [vmem:[%s752_s12 + $0x4f0] sm:$0xff] }
  0x86   : > { %2144 = vst [vmem:[#allocation100_spill] sm:$0xff] %v1211_v61  ;;  %v1232_v61 = vld [vmem:[%s752_s12 + $0x4f8] sm:$0xff] }
  0x87   : > { %2145 = vst [vmem:[#allocation101_spill] sm:$0xff] %v1214_v62  ;;  %v1235_v62 = vld [vmem:[%s752_s12 + $0x500] sm:$0xff] }
  0x88   : > { %2146 = vst [vmem:[#allocation102_spill] sm:$0xff] %v1217_v63  ;;  %v1238_v63 = vld [vmem:[%s752_s12 + $0x508] sm:$0xff] }
  0x89   : > { %2147 = vst [vmem:[#allocation103_spill] sm:$0xff] %v1220_v57  ;;  %v1241_v57 = vld [vmem:[%s752_s12 + $0x510] sm:$0xff] }
  0x8a   : > { %2148 = vst [vmem:[#allocation104_spill] sm:$0xff] %v1223_v58  ;;  %v1244_v58 = vld [vmem:[%s752_s12 + $0x518] sm:$0xff] }
  0x8b   : > { %2149 = vst [vmem:[#allocation105_spill] sm:$0xff] %v1226_v59  ;;  %v1247_v59 = vld [vmem:[%s752_s12 + $0x520] sm:$0xff] }
  0x8c   : > { %2150 = vst [vmem:[#allocation106_spill] sm:$0xff] %v1229_v60  ;;  %v1250_v60 = vld [vmem:[%s752_s12 + $0x528] sm:$0xff] }
  0x8d   : > { %2151 = vst [vmem:[#allocation107_spill] sm:$0xff] %v1232_v61  ;;  %v1253_v61 = vld [vmem:[%s752_s12 + $0x530] sm:$0xff] }
  0x8e   : > { %2152 = vst [vmem:[#allocation108_spill] sm:$0xff] %v1235_v62  ;;  %v1256_v62 = vld [vmem:[%s752_s12 + $0x538] sm:$0xff] }
  0x8f   : > { %2153 = vst [vmem:[#allocation109_spill] sm:$0xff] %v1238_v63  ;;  %v1259_v63 = vld [vmem:[%s752_s12 + $0x540] sm:$0xff] }
  0x90   : > { %2154 = vst [vmem:[#allocation110_spill] sm:$0xff] %v1241_v57  ;;  %v1262_v57 = vld [vmem:[%s752_s12 + $0x548] sm:$0xff] }
  0x91   : > { %2155 = vst [vmem:[#allocation111_spill] sm:$0xff] %v1244_v58  ;;  %v1265_v58 = vld [vmem:[%s752_s12 + $0x550] sm:$0xff] }
  0x92   : > { %2156 = vst [vmem:[#allocation112_spill] sm:$0xff] %v1247_v59  ;;  %v1268_v59 = vld [vmem:[%s752_s12 + $0x558] sm:$0xff] }
  0x93   : > { %2157 = vst [vmem:[#allocation113_spill] sm:$0xff] %v1250_v60  ;;  %v1271_v60 = vld [vmem:[%s752_s12 + $0x560] sm:$0xff] }
  0x94   : > { %2158 = vst [vmem:[#allocation114_spill] sm:$0xff] %v1253_v61  ;;  %v1274_v61 = vld [vmem:[%s752_s12 + $0x568] sm:$0xff] }
  0x95   : > { %2159 = vst [vmem:[#allocation115_spill] sm:$0xff] %v1256_v62  ;;  %v1277_v62 = vld [vmem:[%s752_s12 + $0x570] sm:$0xff] }
  0x96   : > { %2160 = vst [vmem:[#allocation116_spill] sm:$0xff] %v1259_v63  ;;  %v1280_v63 = vld [vmem:[%s752_s12 + $0x578] sm:$0xff] }
  0x97   : > { %2161 = vst [vmem:[#allocation117_spill] sm:$0xff] %v1262_v57  ;;  %v1283_v57 = vld [vmem:[%s752_s12 + $0x580] sm:$0xff] }
  0x98   : > { %2162 = vst [vmem:[#allocation118_spill] sm:$0xff] %v1265_v58  ;;  %v1286_v58 = vld [vmem:[%s752_s12 + $0x588] sm:$0xff] }
  0x99   : > { %2163 = vst [vmem:[#allocation119_spill] sm:$0xff] %v1268_v59  ;;  %v1289_v59 = vld [vmem:[%s752_s12 + $0x590] sm:$0xff] }
  0x9a   : > { %2164 = vst [vmem:[#allocation120_spill] sm:$0xff] %v1271_v60  ;;  %v1292_v60 = vld [vmem:[%s752_s12 + $0x598] sm:$0xff] }
  0x9b   : > { %2165 = vst [vmem:[#allocation121_spill] sm:$0xff] %v1274_v61  ;;  %v1295_v61 = vld [vmem:[%s752_s12 + $0x5a0] sm:$0xff] }
  0x9c   : > { %2166 = vst [vmem:[#allocation122_spill] sm:$0xff] %v1277_v62  ;;  %v1298_v62 = vld [vmem:[%s752_s12 + $0x5a8] sm:$0xff] }
  0x9d   : > { %2167 = vst [vmem:[#allocation123_spill] sm:$0xff] %v1280_v63  ;;  %v1301_v63 = vld [vmem:[%s752_s12 + $0x5b0] sm:$0xff] }
  0x9e   : > { %2168 = vst [vmem:[#allocation124_spill] sm:$0xff] %v1283_v57  ;;  %v1304_v57 = vld [vmem:[%s752_s12 + $0x5b8] sm:$0xff] }
  0x9f   : > { %2169 = vst [vmem:[#allocation125_spill] sm:$0xff] %v1286_v58  ;;  %v1307_v58 = vld [vmem:[%s752_s12 + $0x5c0] sm:$0xff] }
  0xa0   : > { %2170 = vst [vmem:[#allocation126_spill] sm:$0xff] %v1289_v59  ;;  %v1310_v59 = vld [vmem:[%s752_s12 + $0x5c8] sm:$0xff] }
  0xa1   : > { %2171 = vst [vmem:[#allocation127_spill] sm:$0xff] %v1292_v60  ;;  %v1313_v60 = vld [vmem:[%s752_s12 + $0x5d0] sm:$0xff] }
  0xa2   : > { %2172 = vst [vmem:[#allocation128_spill] sm:$0xff] %v1295_v61  ;;  %v1316_v61 = vld [vmem:[%s752_s12 + $0x5d8] sm:$0xff] }
  0xa3   : > { %2173 = vst [vmem:[#allocation129_spill] sm:$0xff] %v1298_v62  ;;  %v1319_v62 = vld [vmem:[%s752_s12 + $0x5e0] sm:$0xff] }
  0xa4   : > { %2174 = vst [vmem:[#allocation130_spill] sm:$0xff] %v1301_v63  ;;  %v1322_v63 = vld [vmem:[%s752_s12 + $0x5e8] sm:$0xff] }
  0xa5   : > { %2175 = vst [vmem:[#allocation131_spill] sm:$0xff] %v1304_v57  ;;  %v1325_v57 = vld [vmem:[%s752_s12 + $0x5f0] sm:$0xff] }
  0xa6   : > { %2176 = vst [vmem:[#allocation132_spill] sm:$0xff] %v1307_v58  ;;  %v1328_v58 = vld [vmem:[%s752_s12 + $0x5f8] sm:$0xff] }
  0xa7   : > { %2177 = vst [vmem:[#allocation133_spill] sm:$0xff] %v1310_v59  ;;  %v1331_v59 = vld [vmem:[%s752_s12 + $0x600] sm:$0xff] }
  0xa8   : > { %2178 = vst [vmem:[#allocation134_spill] sm:$0xff] %v1313_v60  ;;  %v1334_v60 = vld [vmem:[%s752_s12 + $0x608] sm:$0xff] }
  0xa9   : > { %2179 = vst [vmem:[#allocation135_spill] sm:$0xff] %v1316_v61  ;;  %v1337_v61 = vld [vmem:[%s752_s12 + $0x610] sm:$0xff] }
  0xaa   : > { %2180 = vst [vmem:[#allocation136_spill] sm:$0xff] %v1319_v62  ;;  %v1340_v62 = vld [vmem:[%s752_s12 + $0x618] sm:$0xff] }
  0xab   : > { %2181 = vst [vmem:[#allocation137_spill] sm:$0xff] %v1322_v63  ;;  %v1343_v63 = vld [vmem:[%s752_s12 + $0x620] sm:$0xff] }
  0xac   : > { %2182 = vst [vmem:[#allocation138_spill] sm:$0xff] %v1325_v57  ;;  %v1346_v57 = vld [vmem:[%s752_s12 + $0x628] sm:$0xff] }
  0xad   : > { %2183 = vst [vmem:[#allocation139_spill] sm:$0xff] %v1328_v58  ;;  %v1349_v58 = vld [vmem:[%s752_s12 + $0x630] sm:$0xff] }
  0xae   : > { %2184 = vst [vmem:[#allocation140_spill] sm:$0xff] %v1331_v59  ;;  %v1352_v59 = vld [vmem:[%s752_s12 + $0x638] sm:$0xff] }
  0xaf   : > { %2185 = vst [vmem:[#allocation141_spill] sm:$0xff] %v1334_v60  ;;  %v1355_v60 = vld [vmem:[%s752_s12 + $0x640] sm:$0xff] }
  0xb0   : > { %2186 = vst [vmem:[#allocation142_spill] sm:$0xff] %v1337_v61  ;;  %v1358_v61 = vld [vmem:[%s752_s12 + $0x648] sm:$0xff] }
  0xb1   : > { %2187 = vst [vmem:[#allocation143_spill] sm:$0xff] %v1340_v62  ;;  %v1361_v62 = vld [vmem:[%s752_s12 + $0x650] sm:$0xff] }
  0xb2   : > { %2188 = vst [vmem:[#allocation144_spill] sm:$0xff] %v1343_v63  ;;  %v1364_v63 = vld [vmem:[%s752_s12 + $0x658] sm:$0xff] }
  0xb3   : > { %2189 = vst [vmem:[#allocation145_spill] sm:$0xff] %v1346_v57  ;;  %v1367_v57 = vld [vmem:[%s752_s12 + $0x660] sm:$0xff] }
  0xb4   : > { %2190 = vst [vmem:[#allocation146_spill] sm:$0xff] %v1349_v58  ;;  %v1370_v58 = vld [vmem:[%s752_s12 + $0x668] sm:$0xff] }
  0xb5   : > { %2191 = vst [vmem:[#allocation147_spill] sm:$0xff] %v1352_v59  ;;  %v1373_v59 = vld [vmem:[%s752_s12 + $0x670] sm:$0xff] }
  0xb6   : > { %2192 = vst [vmem:[#allocation148_spill] sm:$0xff] %v1355_v60  ;;  %v1376_v60 = vld [vmem:[%s752_s12 + $0x678] sm:$0xff] }
  0xb7   : > { %2193 = vst [vmem:[#allocation149_spill] sm:$0xff] %v1358_v61  ;;  %v1379_v61 = vld [vmem:[%s752_s12 + $0x680] sm:$0xff] }
  0xb8   : > { %2194 = vst [vmem:[#allocation150_spill] sm:$0xff] %v1361_v62  ;;  %v1382_v62 = vld [vmem:[%s752_s12 + $0x688] sm:$0xff] }
  0xb9   : > { %2195 = vst [vmem:[#allocation151_spill] sm:$0xff] %v1364_v63  ;;  %v1385_v63 = vld [vmem:[%s752_s12 + $0x690] sm:$0xff] }
  0xba   : > { %2196 = vst [vmem:[#allocation152_spill] sm:$0xff] %v1367_v57  ;;  %v1388_v57 = vld [vmem:[%s752_s12 + $0x698] sm:$0xff] }
  0xbb   : > { %2197 = vst [vmem:[#allocation153_spill] sm:$0xff] %v1370_v58  ;;  %v1391_v58 = vld [vmem:[%s752_s12 + $0x6a0] sm:$0xff] }
  0xbc   : > { %2198 = vst [vmem:[#allocation154_spill] sm:$0xff] %v1373_v59  ;;  %v1394_v59 = vld [vmem:[%s752_s12 + $0x6a8] sm:$0xff] }
  0xbd   : > { %2199 = vst [vmem:[#allocation155_spill] sm:$0xff] %v1376_v60  ;;  %v1397_v60 = vld [vmem:[%s752_s12 + $0x6b0] sm:$0xff] }
  0xbe   : > { %2200 = vst [vmem:[#allocation156_spill] sm:$0xff] %v1379_v61  ;;  %v1400_v61 = vld [vmem:[%s752_s12 + $0x6b8] sm:$0xff] }
  0xbf   : > { %2201 = vst [vmem:[#allocation157_spill] sm:$0xff] %v1382_v62  ;;  %v1403_v62 = vld [vmem:[%s752_s12 + $0x6c0] sm:$0xff] }
  0xc0   : > { %2202 = vst [vmem:[#allocation158_spill] sm:$0xff] %v1385_v63  ;;  %v1406_v63 = vld [vmem:[%s752_s12 + $0x6c8] sm:$0xff] }
  0xc1   : > { %2203 = vst [vmem:[#allocation159_spill] sm:$0xff] %v1388_v57  ;;  %v1409_v57 = vld [vmem:[%s752_s12 + $0x6d0] sm:$0xff] }
  0xc2   : > { %2204 = vst [vmem:[#allocation160_spill] sm:$0xff] %v1391_v58  ;;  %v1412_v58 = vld [vmem:[%s752_s12 + $0x6d8] sm:$0xff] }
  0xc3   : > { %2205 = vst [vmem:[#allocation161_spill] sm:$0xff] %v1394_v59  ;;  %v1415_v59 = vld [vmem:[%s752_s12 + $0x6e0] sm:$0xff] }
  0xc4   : > { %2206 = vst [vmem:[#allocation162_spill] sm:$0xff] %v1397_v60  ;;  %v1418_v60 = vld [vmem:[%s752_s12 + $0x6e8] sm:$0xff] }
  0xc5   : > { %2207 = vst [vmem:[#allocation163_spill] sm:$0xff] %v1400_v61  ;;  %v1421_v61 = vld [vmem:[%s752_s12 + $0x6f0] sm:$0xff] }
  0xc6   : > { %2208 = vst [vmem:[#allocation164_spill] sm:$0xff] %v1403_v62  ;;  %v1424_v62 = vld [vmem:[%s752_s12 + $0x6f8] sm:$0xff] }
  0xc7   : > { %2209 = vst [vmem:[#allocation165_spill] sm:$0xff] %v1406_v63  ;;  %v1427_v63 = vld [vmem:[%s752_s12 + $0x700] sm:$0xff] }
  0xc8   : > { %2210 = vst [vmem:[#allocation166_spill] sm:$0xff] %v1409_v57  ;;  %v1430_v57 = vld [vmem:[%s752_s12 + $0x708] sm:$0xff] }
  0xc9   : > { %2211 = vst [vmem:[#allocation167_spill] sm:$0xff] %v1412_v58  ;;  %v1433_v58 = vld [vmem:[%s752_s12 + $0x710] sm:$0xff] }
  0xca   : > { %2212 = vst [vmem:[#allocation168_spill] sm:$0xff] %v1415_v59  ;;  %v1436_v59 = vld [vmem:[%s752_s12 + $0x718] sm:$0xff] }
  0xcb   : > { %2213 = vst [vmem:[#allocation169_spill] sm:$0xff] %v1418_v60  ;;  %v1439_v60 = vld [vmem:[%s752_s12 + $0x720] sm:$0xff] }
  0xcc   : > { %2214 = vst [vmem:[#allocation170_spill] sm:$0xff] %v1421_v61  ;;  %v1442_v61 = vld [vmem:[%s752_s12 + $0x728] sm:$0xff] }
  0xcd   : > { %2215 = vst [vmem:[#allocation171_spill] sm:$0xff] %v1424_v62  ;;  %v1445_v62 = vld [vmem:[%s752_s12 + $0x730] sm:$0xff] }
  0xce   : > { %2216 = vst [vmem:[#allocation172_spill] sm:$0xff] %v1427_v63  ;;  %v1448_v63 = vld [vmem:[%s752_s12 + $0x738] sm:$0xff] }
  0xcf   : > { %2217 = vst [vmem:[#allocation173_spill] sm:$0xff] %v1430_v57  ;;  %v1451_v57 = vld [vmem:[%s752_s12 + $0x740] sm:$0xff] }
  0xd0   : > { %2218 = vst [vmem:[#allocation174_spill] sm:$0xff] %v1433_v58  ;;  %v1454_v58 = vld [vmem:[%s752_s12 + $0x748] sm:$0xff] }
  0xd1   : > { %2219 = vst [vmem:[#allocation175_spill] sm:$0xff] %v1436_v59  ;;  %v1457_v59 = vld [vmem:[%s752_s12 + $0x750] sm:$0xff] }
  0xd2   : > { %2220 = vst [vmem:[#allocation176_spill] sm:$0xff] %v1439_v60  ;;  %v1460_v60 = vld [vmem:[%s752_s12 + $0x758] sm:$0xff] }
  0xd3   : > { %2221 = vst [vmem:[#allocation177_spill] sm:$0xff] %v1442_v61  ;;  %v1463_v61 = vld [vmem:[%s752_s12 + $0x760] sm:$0xff] }
  0xd4   : > { %2222 = vst [vmem:[#allocation178_spill] sm:$0xff] %v1445_v62  ;;  %v1466_v62 = vld [vmem:[%s752_s12 + $0x768] sm:$0xff] }
  0xd5   : > { %2223 = vst [vmem:[#allocation179_spill] sm:$0xff] %v1448_v63  ;;  %v1469_v63 = vld [vmem:[%s752_s12 + $0x770] sm:$0xff] }
  0xd6   : > { %2224 = vst [vmem:[#allocation180_spill] sm:$0xff] %v1451_v57  ;;  %v1472_v57 = vld [vmem:[%s752_s12 + $0x778] sm:$0xff] }
  0xd7   : > { %2225 = vst [vmem:[#allocation181_spill] sm:$0xff] %v1454_v58  ;;  %v1475_v58 = vld [vmem:[%s752_s12 + $0x780] sm:$0xff] }
  0xd8   : > { %2226 = vst [vmem:[#allocation182_spill] sm:$0xff] %v1457_v59  ;;  %v1478_v59 = vld [vmem:[%s752_s12 + $0x788] sm:$0xff] }
  0xd9   : > { %2227 = vst [vmem:[#allocation183_spill] sm:$0xff] %v1460_v60  ;;  %v1484_v60 = vld [vmem:[%s752_s12 + $0x798] sm:$0xff] }
  0xda   : > { %2228 = vst [vmem:[#allocation184_spill] sm:$0xff] %v1463_v61  ;;  %v1487_v61 = vld [vmem:[%s752_s12 + $0x7a0] sm:$0xff] }
  0xdb   : > { %2229 = vst [vmem:[#allocation185_spill] sm:$0xff] %v1466_v62  ;;  %v1493_v62 = vld [vmem:[%s752_s12 + $0x7b0] sm:$0xff] }
  0xdc   : > { %2230 = vst [vmem:[#allocation186_spill] sm:$0xff] %v1469_v63  ;;  %v1496_v63 = vld [vmem:[%s752_s12 + $0x7b8] sm:$0xff] }
  0xdd   : > { %2231 = vst [vmem:[#allocation187_spill] sm:$0xff] %v1481_v56  ;;  %v1527_v56 = vld [vmem:[%s752_s12 + $0x7f8] sm:$0xff] }
  0xde   : > { %2232 = vst [vmem:[#allocation188_spill] sm:$0xff] %v1484_v60  ;;  %v1524_v60 = vld [vmem:[%s752_s12 + $0x7f0] sm:$0xff] }
  0xdf   : > { %2233 = vst [vmem:[#allocation189_spill] sm:$0xff] %v1487_v61  ;;  %v1521_v61 = vld [vmem:[%s752_s12 + $0x7e8] sm:$0xff] }
  0xe0   : > { %2234 = vst [vmem:[#allocation190_spill] sm:$0xff] %v1490_v55  ;;  %v1518_v55 = vld [vmem:[%s752_s12 + $0x7e0] sm:$0xff] }
  0xe1   : > { %2235 = vst [vmem:[#allocation191_spill] sm:$0xff] %v1493_v62  ;;  %v1509_v62 = vld [vmem:[%s752_s12 + $0x7c8] sm:$0xff] }
  0xe2   : > { %2236 = vst [vmem:[#allocation192_spill] sm:$0xff] %v1496_v63  ;;  %v1512_v63 = vld [vmem:[%s752_s12 + $0x7d0] sm:$0xff] }
  0xe3   : > { %2237 = vst [vmem:[#allocation193_spill] sm:$0xff] %v1499_v54  ;;  %v1515_v54 = vld [vmem:[%s752_s12 + $0x7d8] sm:$0xff] }
  0xe4   : > { %381 = vst [vmem:[%s1506_s15] sm:$0xff] %v755_v0  ;;  %v2238_v0 = vld [vmem:[#allocation2_spill] sm:$0xff] }
  0xe5   : > { %382 = vst [vmem:[%s1506_s15 + $0x8] sm:$0xff] %v758_v1  ;;  %v2239_v1 = vld [vmem:[#allocation3_spill] sm:$0xff] }
  0xe6   : > { %383 = vst [vmem:[%s1506_s15 + $0x10] sm:$0xff] %v761_v2  ;;  %v2240_v2 = vld [vmem:[#allocation4_spill] sm:$0xff] }
  0xe7   : > { %384 = vst [vmem:[%s1506_s15 + $0x18] sm:$0xff] %v764_v3  ;;  %v2241_v3 = vld [vmem:[#allocation5_spill] sm:$0xff] }
  0xe8   : > { %385 = vst [vmem:[%s1506_s15 + $0x20] sm:$0xff] %v767_v4  ;;  %v2242_v4 = vld [vmem:[#allocation6_spill] sm:$0xff] }
  0xe9   : > { %386 = vst [vmem:[%s1506_s15 + $0x28] sm:$0xff] %v770_v5  ;;  %v2243_v5 = vld [vmem:[#allocation7_spill] sm:$0xff] }
  0xea   : > { %387 = vst [vmem:[%s1506_s15 + $0x30] sm:$0xff] %v773_v6  ;;  %v2244_v6 = vld [vmem:[#allocation8_spill] sm:$0xff] }
  0xeb   : > { %388 = vst [vmem:[%s1506_s15 + $0x38] sm:$0xff] %v776_v7  ;;  %v2245_v7 = vld [vmem:[#allocation9_spill] sm:$0xff] }
  0xec   : > { %389 = vst [vmem:[%s1506_s15 + $0x40] sm:$0xff] %v779_v8  ;;  %v2246_v8 = vld [vmem:[#allocation10_spill] sm:$0xff] }
  0xed   : > { %390 = vst [vmem:[%s1506_s15 + $0x48] sm:$0xff] %v782_v9  ;;  %v2247_v9 = vld [vmem:[#allocation11_spill] sm:$0xff] }
  0xee   : > { %391 = vst [vmem:[%s1506_s15 + $0x50] sm:$0xff] %v785_v10  ;;  %v2248_v10 = vld [vmem:[#allocation12_spill] sm:$0xff] }
  0xef   : > { %392 = vst [vmem:[%s1506_s15 + $0x58] sm:$0xff] %v788_v11  ;;  %v2249_v11 = vld [vmem:[#allocation13_spill] sm:$0xff] }
  0xf0   : > { %393 = vst [vmem:[%s1506_s15 + $0x60] sm:$0xff] %v791_v12  ;;  %v2250_v12 = vld [vmem:[#allocation14_spill] sm:$0xff] }
  0xf1   : > { %394 = vst [vmem:[%s1506_s15 + $0x68] sm:$0xff] %v794_v13  ;;  %v2251_v13 = vld [vmem:[#allocation15_spill] sm:$0xff] }
  0xf2   : > { %395 = vst [vmem:[%s1506_s15 + $0x70] sm:$0xff] %v797_v14  ;;  %v2252_v14 = vld [vmem:[#allocation16_spill] sm:$0xff] }
  0xf3   : > { %396 = vst [vmem:[%s1506_s15 + $0x78] sm:$0xff] %v800_v15  ;;  %v2253_v15 = vld [vmem:[#allocation17_spill] sm:$0xff] }
  0xf4   : > { %397 = vst [vmem:[%s1506_s15 + $0x80] sm:$0xff] %v803_v16  ;;  %v2254_v16 = vld [vmem:[#allocation18_spill] sm:$0xff] }
  0xf5   : > { %398 = vst [vmem:[%s1506_s15 + $0x88] sm:$0xff] %v806_v17  ;;  %v2255_v17 = vld [vmem:[#allocation19_spill] sm:$0xff] }
  0xf6   : > { %399 = vst [vmem:[%s1506_s15 + $0x90] sm:$0xff] %v809_v18  ;;  %v2256_v18 = vld [vmem:[#allocation20_spill] sm:$0xff] }
  0xf7   : > { %400 = vst [vmem:[%s1506_s15 + $0x98] sm:$0xff] %v812_v19  ;;  %v2257_v19 = vld [vmem:[#allocation21_spill] sm:$0xff] }
  0xf8   : > { %401 = vst [vmem:[%s1506_s15 + $0xa0] sm:$0xff] %v815_v20  ;;  %v2258_v20 = vld [vmem:[#allocation22_spill] sm:$0xff] }
  0xf9   : > { %402 = vst [vmem:[%s1506_s15 + $0xa8] sm:$0xff] %v818_v21  ;;  %v2259_v21 = vld [vmem:[#allocation23_spill] sm:$0xff] }
  0xfa   : > { %403 = vst [vmem:[%s1506_s15 + $0xb0] sm:$0xff] %v821_v22  ;;  %v2260_v22 = vld [vmem:[#allocation24_spill] sm:$0xff] }
  0xfb   : > { %404 = vst [vmem:[%s1506_s15 + $0xb8] sm:$0xff] %v824_v23  ;;  %v2261_v23 = vld [vmem:[#allocation25_spill] sm:$0xff] }
  0xfc   : > { %405 = vst [vmem:[%s1506_s15 + $0xc0] sm:$0xff] %v827_v24  ;;  %v2262_v24 = vld [vmem:[#allocation26_spill] sm:$0xff] }
  0xfd   : > { %406 = vst [vmem:[%s1506_s15 + $0xc8] sm:$0xff] %v830_v25  ;;  %v2263_v25 = vld [vmem:[#allocation27_spill] sm:$0xff] }
  0xfe   : > { %407 = vst [vmem:[%s1506_s15 + $0xd0] sm:$0xff] %v833_v26  ;;  %v2264_v26 = vld [vmem:[#allocation28_spill] sm:$0xff] }
  0xff   : > { %408 = vst [vmem:[%s1506_s15 + $0xd8] sm:$0xff] %v836_v27  ;;  %v2265_v27 = vld [vmem:[#allocation29_spill] sm:$0xff] }
 0x100   : > { %409 = vst [vmem:[%s1506_s15 + $0xe0] sm:$0xff] %v839_v28  ;;  %v2266_v28 = vld [vmem:[#allocation30_spill] sm:$0xff] }
 0x101   : > { %410 = vst [vmem:[%s1506_s15 + $0xe8] sm:$0xff] %v842_v29  ;;  %v2267_v29 = vld [vmem:[#allocation31_spill] sm:$0xff] }
 0x102   : > { %411 = vst [vmem:[%s1506_s15 + $0xf0] sm:$0xff] %v845_v30  ;;  %v2268_v30 = vld [vmem:[#allocation32_spill] sm:$0xff] }
 0x103   : > { %412 = vst [vmem:[%s1506_s15 + $0xf8] sm:$0xff] %v848_v31  ;;  %v2269_v31 = vld [vmem:[#allocation33_spill] sm:$0xff] }
 0x104   : > { %413 = vst [vmem:[%s1506_s15 + $0x100] sm:$0xff] %v851_v32  ;;  %v2270_v32 = vld [vmem:[#allocation34_spill] sm:$0xff] }
 0x105   : > { %414 = vst [vmem:[%s1506_s15 + $0x108] sm:$0xff] %v854_v33  ;;  %v2271_v33 = vld [vmem:[#allocation35_spill] sm:$0xff] }
 0x106   : > { %415 = vst [vmem:[%s1506_s15 + $0x110] sm:$0xff] %v857_v34  ;;  %v2272_v34 = vld [vmem:[#allocation36_spill] sm:$0xff] }
 0x107   : > { %416 = vst [vmem:[%s1506_s15 + $0x118] sm:$0xff] %v860_v35  ;;  %v2273_v35 = vld [vmem:[#allocation37_spill] sm:$0xff] }
 0x108   : > { %417 = vst [vmem:[%s1506_s15 + $0x120] sm:$0xff] %v863_v36  ;;  %v2274_v36 = vld [vmem:[#allocation38_spill] sm:$0xff] }
 0x109   : > { %418 = vst [vmem:[%s1506_s15 + $0x128] sm:$0xff] %v866_v37  ;;  %v2275_v37 = vld [vmem:[#allocation39_spill] sm:$0xff] }
 0x10a   : > { %419 = vst [vmem:[%s1506_s15 + $0x130] sm:$0xff] %v869_v38  ;;  %v2276_v38 = vld [vmem:[#allocation40_spill] sm:$0xff] }
 0x10b   : > { %420 = vst [vmem:[%s1506_s15 + $0x138] sm:$0xff] %v872_v39  ;;  %v2277_v39 = vld [vmem:[#allocation41_spill] sm:$0xff] }
 0x10c   : > { %421 = vst [vmem:[%s1506_s15 + $0x140] sm:$0xff] %v875_v40  ;;  %v2278_v40 = vld [vmem:[#allocation42_spill] sm:$0xff] }
 0x10d   : > { %422 = vst [vmem:[%s1506_s15 + $0x148] sm:$0xff] %v878_v41  ;;  %v2279_v41 = vld [vmem:[#allocation43_spill] sm:$0xff] }
 0x10e   : > { %423 = vst [vmem:[%s1506_s15 + $0x150] sm:$0xff] %v881_v42  ;;  %v2280_v42 = vld [vmem:[#allocation44_spill] sm:$0xff] }
 0x10f   : > { %424 = vst [vmem:[%s1506_s15 + $0x158] sm:$0xff] %v884_v43  ;;  %v2281_v43 = vld [vmem:[#allocation45_spill] sm:$0xff] }
 0x110   : > { %425 = vst [vmem:[%s1506_s15 + $0x160] sm:$0xff] %v887_v44  ;;  %v2282_v44 = vld [vmem:[#allocation46_spill] sm:$0xff] }
 0x111   : > { %426 = vst [vmem:[%s1506_s15 + $0x168] sm:$0xff] %v890_v45  ;;  %v2283_v45 = vld [vmem:[#allocation47_spill] sm:$0xff] }
 0x112   : > { %427 = vst [vmem:[%s1506_s15 + $0x170] sm:$0xff] %v893_v46  ;;  %v2284_v46 = vld [vmem:[#allocation48_spill] sm:$0xff] }
 0x113   : > { %428 = vst [vmem:[%s1506_s15 + $0x178] sm:$0xff] %v896_v47  ;;  %v2285_v47 = vld [vmem:[#allocation49_spill] sm:$0xff] }
 0x114   : > { %429 = vst [vmem:[%s1506_s15 + $0x180] sm:$0xff] %v899_v48  ;;  %v2286_v48 = vld [vmem:[#allocation50_spill] sm:$0xff] }
 0x115   : > { %430 = vst [vmem:[%s1506_s15 + $0x188] sm:$0xff] %v902_v49  ;;  %v2287_v49 = vld [vmem:[#allocation51_spill] sm:$0xff] }
 0x116   : > { %431 = vst [vmem:[%s1506_s15 + $0x190] sm:$0xff] %v905_v50  ;;  %v2288_v50 = vld [vmem:[#allocation52_spill] sm:$0xff] }
 0x117   : > { %432 = vst [vmem:[%s1506_s15 + $0x198] sm:$0xff] %v908_v51  ;;  %v2289_v51 = vld [vmem:[#allocation53_spill] sm:$0xff] }
 0x118   : > { %433 = vst [vmem:[%s1506_s15 + $0x1a0] sm:$0xff] %v911_v52  ;;  %v2290_v52 = vld [vmem:[#allocation54_spill] sm:$0xff] }
 0x119   : > { %434 = vst [vmem:[%s1506_s15 + $0x1a8] sm:$0xff] %v914_v53  ;;  %v2291_v53 = vld [vmem:[#allocation55_spill] sm:$0xff] }
 0x11a   : > { %435 = vst [vmem:[%s1506_s15 + $0x1b0] sm:$0xff] %v2238_v0  ;;  %v2292_v0 = vld [vmem:[#allocation56_spill] sm:$0xff] }
 0x11b   : > { %436 = vst [vmem:[%s1506_s15 + $0x1b8] sm:$0xff] %v2239_v1  ;;  %v2293_v1 = vld [vmem:[#allocation57_spill] sm:$0xff] }
 0x11c   : > { %437 = vst [vmem:[%s1506_s15 + $0x1c0] sm:$0xff] %v2240_v2  ;;  %v2294_v2 = vld [vmem:[#allocation58_spill] sm:$0xff] }
 0x11d   : > { %438 = vst [vmem:[%s1506_s15 + $0x1c8] sm:$0xff] %v2241_v3  ;;  %v2295_v3 = vld [vmem:[#allocation59_spill] sm:$0xff] }
 0x11e   : > { %439 = vst [vmem:[%s1506_s15 + $0x1d0] sm:$0xff] %v2242_v4  ;;  %v2296_v4 = vld [vmem:[#allocation60_spill] sm:$0xff] }
 0x11f   : > { %440 = vst [vmem:[%s1506_s15 + $0x1d8] sm:$0xff] %v2243_v5  ;;  %v2297_v5 = vld [vmem:[#allocation61_spill] sm:$0xff] }
 0x120   : > { %441 = vst [vmem:[%s1506_s15 + $0x1e0] sm:$0xff] %v2244_v6  ;;  %v2298_v6 = vld [vmem:[#allocation62_spill] sm:$0xff] }
 0x121   : > { %442 = vst [vmem:[%s1506_s15 + $0x1e8] sm:$0xff] %v2245_v7  ;;  %v2299_v7 = vld [vmem:[#allocation63_spill] sm:$0xff] }
 0x122   : > { %443 = vst [vmem:[%s1506_s15 + $0x1f0] sm:$0xff] %v2246_v8  ;;  %v2300_v8 = vld [vmem:[#allocation64_spill] sm:$0xff] }
 0x123   : > { %444 = vst [vmem:[%s1506_s15 + $0x1f8] sm:$0xff] %v2247_v9  ;;  %v2301_v9 = vld [vmem:[#allocation65_spill] sm:$0xff] }
 0x124   : > { %445 = vst [vmem:[%s1506_s15 + $0x200] sm:$0xff] %v2248_v10  ;;  %v2302_v10 = vld [vmem:[#allocation66_spill] sm:$0xff] }
 0x125   : > { %446 = vst [vmem:[%s1506_s15 + $0x208] sm:$0xff] %v2249_v11  ;;  %v2303_v11 = vld [vmem:[#allocation67_spill] sm:$0xff] }
 0x126   : > { %447 = vst [vmem:[%s1506_s15 + $0x210] sm:$0xff] %v2250_v12  ;;  %v2304_v12 = vld [vmem:[#allocation68_spill] sm:$0xff] }
 0x127   : > { %448 = vst [vmem:[%s1506_s15 + $0x218] sm:$0xff] %v2251_v13  ;;  %v2305_v13 = vld [vmem:[#allocation69_spill] sm:$0xff] }
 0x128   : > { %449 = vst [vmem:[%s1506_s15 + $0x220] sm:$0xff] %v2252_v14  ;;  %v2306_v14 = vld [vmem:[#allocation70_spill] sm:$0xff] }
 0x129   : > { %450 = vst [vmem:[%s1506_s15 + $0x228] sm:$0xff] %v2253_v15  ;;  %v2307_v15 = vld [vmem:[#allocation71_spill] sm:$0xff] }
 0x12a   : > { %451 = vst [vmem:[%s1506_s15 + $0x230] sm:$0xff] %v2254_v16  ;;  %v2308_v16 = vld [vmem:[#allocation72_spill] sm:$0xff] }
 0x12b   : > { %452 = vst [vmem:[%s1506_s15 + $0x238] sm:$0xff] %v2255_v17  ;;  %v2309_v17 = vld [vmem:[#allocation73_spill] sm:$0xff] }
 0x12c   : > { %453 = vst [vmem:[%s1506_s15 + $0x240] sm:$0xff] %v2256_v18  ;;  %v2310_v18 = vld [vmem:[#allocation74_spill] sm:$0xff] }
 0x12d   : > { %454 = vst [vmem:[%s1506_s15 + $0x248] sm:$0xff] %v2257_v19  ;;  %v2311_v19 = vld [vmem:[#allocation75_spill] sm:$0xff] }
 0x12e   : > { %455 = vst [vmem:[%s1506_s15 + $0x250] sm:$0xff] %v2258_v20  ;;  %v2312_v20 = vld [vmem:[#allocation76_spill] sm:$0xff] }
 0x12f   : > { %456 = vst [vmem:[%s1506_s15 + $0x258] sm:$0xff] %v2259_v21  ;;  %v2313_v21 = vld [vmem:[#allocation77_spill] sm:$0xff] }
 0x130   : > { %457 = vst [vmem:[%s1506_s15 + $0x260] sm:$0xff] %v2260_v22  ;;  %v2314_v22 = vld [vmem:[#allocation78_spill] sm:$0xff] }
 0x131   : > { %458 = vst [vmem:[%s1506_s15 + $0x268] sm:$0xff] %v2261_v23  ;;  %v2315_v23 = vld [vmem:[#allocation79_spill] sm:$0xff] }
 0x132   : > { %459 = vst [vmem:[%s1506_s15 + $0x270] sm:$0xff] %v2262_v24  ;;  %v2316_v24 = vld [vmem:[#allocation80_spill] sm:$0xff] }
 0x133   : > { %460 = vst [vmem:[%s1506_s15 + $0x278] sm:$0xff] %v2263_v25  ;;  %v2317_v25 = vld [vmem:[#allocation81_spill] sm:$0xff] }
 0x134   : > { %461 = vst [vmem:[%s1506_s15 + $0x280] sm:$0xff] %v2264_v26  ;;  %v2318_v26 = vld [vmem:[#allocation82_spill] sm:$0xff] }
 0x135   : > { %462 = vst [vmem:[%s1506_s15 + $0x288] sm:$0xff] %v2265_v27  ;;  %v2319_v27 = vld [vmem:[#allocation83_spill] sm:$0xff] }
 0x136   : > { %463 = vst [vmem:[%s1506_s15 + $0x290] sm:$0xff] %v2266_v28  ;;  %v2320_v28 = vld [vmem:[#allocation84_spill] sm:$0xff] }
 0x137   : > { %464 = vst [vmem:[%s1506_s15 + $0x298] sm:$0xff] %v2267_v29  ;;  %v2321_v29 = vld [vmem:[#allocation85_spill] sm:$0xff] }
 0x138   : > { %465 = vst [vmem:[%s1506_s15 + $0x2a0] sm:$0xff] %v2268_v30  ;;  %v2322_v30 = vld [vmem:[#allocation86_spill] sm:$0xff] }
 0x139   : > { %466 = vst [vmem:[%s1506_s15 + $0x2a8] sm:$0xff] %v2269_v31  ;;  %v2323_v31 = vld [vmem:[#allocation87_spill] sm:$0xff] }
 0x13a   : > { %467 = vst [vmem:[%s1506_s15 + $0x2b0] sm:$0xff] %v2270_v32  ;;  %v2324_v32 = vld [vmem:[#allocation88_spill] sm:$0xff] }
 0x13b   : > { %468 = vst [vmem:[%s1506_s15 + $0x2b8] sm:$0xff] %v2271_v33  ;;  %v2325_v33 = vld [vmem:[#allocation89_spill] sm:$0xff] }
 0x13c   : > { %469 = vst [vmem:[%s1506_s15 + $0x2c0] sm:$0xff] %v2272_v34  ;;  %v2326_v34 = vld [vmem:[#allocation90_spill] sm:$0xff] }
 0x13d   : > { %470 = vst [vmem:[%s1506_s15 + $0x2c8] sm:$0xff] %v2273_v35  ;;  %v2327_v35 = vld [vmem:[#allocation91_spill] sm:$0xff] }
 0x13e   : > { %471 = vst [vmem:[%s1506_s15 + $0x2d0] sm:$0xff] %v2274_v36  ;;  %v2328_v36 = vld [vmem:[#allocation92_spill] sm:$0xff] }
 0x13f   : > { %472 = vst [vmem:[%s1506_s15 + $0x2d8] sm:$0xff] %v2275_v37  ;;  %v2329_v37 = vld [vmem:[#allocation93_spill] sm:$0xff] }
 0x140   : > { %473 = vst [vmem:[%s1506_s15 + $0x2e0] sm:$0xff] %v2276_v38  ;;  %v2330_v38 = vld [vmem:[#allocation94_spill] sm:$0xff] }
 0x141   : > { %474 = vst [vmem:[%s1506_s15 + $0x2e8] sm:$0xff] %v2277_v39  ;;  %v2331_v39 = vld [vmem:[#allocation95_spill] sm:$0xff] }
 0x142   : > { %475 = vst [vmem:[%s1506_s15 + $0x2f0] sm:$0xff] %v2278_v40  ;;  %v2332_v40 = vld [vmem:[#allocation96_spill] sm:$0xff] }
 0x143   : > { %476 = vst [vmem:[%s1506_s15 + $0x2f8] sm:$0xff] %v2279_v41  ;;  %v2333_v41 = vld [vmem:[#allocation97_spill] sm:$0xff] }
 0x144   : > { %477 = vst [vmem:[%s1506_s15 + $0x300] sm:$0xff] %v2280_v42  ;;  %v2334_v42 = vld [vmem:[#allocation98_spill] sm:$0xff] }
 0x145   : > { %478 = vst [vmem:[%s1506_s15 + $0x308] sm:$0xff] %v2281_v43  ;;  %v2335_v43 = vld [vmem:[#allocation99_spill] sm:$0xff] }
 0x146   : > { %479 = vst [vmem:[%s1506_s15 + $0x310] sm:$0xff] %v2282_v44  ;;  %v2336_v44 = vld [vmem:[#allocation100_spill] sm:$0xff] }
 0x147   : > { %480 = vst [vmem:[%s1506_s15 + $0x318] sm:$0xff] %v2283_v45  ;;  %v2337_v45 = vld [vmem:[#allocation101_spill] sm:$0xff] }
 0x148   : > { %481 = vst [vmem:[%s1506_s15 + $0x320] sm:$0xff] %v2284_v46  ;;  %v2338_v46 = vld [vmem:[#allocation102_spill] sm:$0xff] }
 0x149   : > { %482 = vst [vmem:[%s1506_s15 + $0x328] sm:$0xff] %v2285_v47  ;;  %v2339_v47 = vld [vmem:[#allocation103_spill] sm:$0xff] }
 0x14a   : > { %483 = vst [vmem:[%s1506_s15 + $0x330] sm:$0xff] %v2286_v48  ;;  %v2340_v48 = vld [vmem:[#allocation104_spill] sm:$0xff] }
 0x14b   : > { %484 = vst [vmem:[%s1506_s15 + $0x338] sm:$0xff] %v2287_v49  ;;  %v2341_v49 = vld [vmem:[#allocation105_spill] sm:$0xff] }
 0x14c   : > { %485 = vst [vmem:[%s1506_s15 + $0x340] sm:$0xff] %v2288_v50  ;;  %v2342_v50 = vld [vmem:[#allocation106_spill] sm:$0xff] }
 0x14d   : > { %486 = vst [vmem:[%s1506_s15 + $0x348] sm:$0xff] %v2289_v51  ;;  %v2343_v51 = vld [vmem:[#allocation107_spill] sm:$0xff] }
 0x14e   : > { %487 = vst [vmem:[%s1506_s15 + $0x350] sm:$0xff] %v2290_v52  ;;  %v2344_v52 = vld [vmem:[#allocation108_spill] sm:$0xff] }
 0x14f   : > { %488 = vst [vmem:[%s1506_s15 + $0x358] sm:$0xff] %v2291_v53  ;;  %v2345_v53 = vld [vmem:[#allocation109_spill] sm:$0xff] }
 0x150   : > { %489 = vst [vmem:[%s1506_s15 + $0x360] sm:$0xff] %v2292_v0  ;;  %v2346_v0 = vld [vmem:[#allocation110_spill] sm:$0xff] }
 0x151   : > { %490 = vst [vmem:[%s1506_s15 + $0x368] sm:$0xff] %v2293_v1  ;;  %v2347_v1 = vld [vmem:[#allocation111_spill] sm:$0xff] }
 0x152   : > { %491 = vst [vmem:[%s1506_s15 + $0x370] sm:$0xff] %v2294_v2  ;;  %v2348_v2 = vld [vmem:[#allocation112_spill] sm:$0xff] }
 0x153   : > { %492 = vst [vmem:[%s1506_s15 + $0x378] sm:$0xff] %v2295_v3  ;;  %v2349_v3 = vld [vmem:[#allocation113_spill] sm:$0xff] }
 0x154   : > { %493 = vst [vmem:[%s1506_s15 + $0x380] sm:$0xff] %v2296_v4  ;;  %v2350_v4 = vld [vmem:[#allocation114_spill] sm:$0xff] }
 0x155   : > { %494 = vst [vmem:[%s1506_s15 + $0x388] sm:$0xff] %v2297_v5  ;;  %v2351_v5 = vld [vmem:[#allocation115_spill] sm:$0xff] }
 0x156   : > { %495 = vst [vmem:[%s1506_s15 + $0x390] sm:$0xff] %v2298_v6  ;;  %v2352_v6 = vld [vmem:[#allocation116_spill] sm:$0xff] }
 0x157   : > { %496 = vst [vmem:[%s1506_s15 + $0x398] sm:$0xff] %v2299_v7  ;;  %v2353_v7 = vld [vmem:[#allocation117_spill] sm:$0xff] }
 0x158   : > { %497 = vst [vmem:[%s1506_s15 + $0x3a0] sm:$0xff] %v2300_v8  ;;  %v2354_v8 = vld [vmem:[#allocation118_spill] sm:$0xff] }
 0x159   : > { %498 = vst [vmem:[%s1506_s15 + $0x3a8] sm:$0xff] %v2301_v9  ;;  %v2355_v9 = vld [vmem:[#allocation119_spill] sm:$0xff] }
 0x15a   : > { %499 = vst [vmem:[%s1506_s15 + $0x3b0] sm:$0xff] %v2302_v10  ;;  %v2356_v10 = vld [vmem:[#allocation120_spill] sm:$0xff] }
 0x15b   : > { %500 = vst [vmem:[%s1506_s15 + $0x3b8] sm:$0xff] %v2303_v11  ;;  %v2357_v11 = vld [vmem:[#allocation121_spill] sm:$0xff] }
 0x15c   : > { %501 = vst [vmem:[%s1506_s15 + $0x3c0] sm:$0xff] %v2304_v12  ;;  %v2358_v12 = vld [vmem:[#allocation122_spill] sm:$0xff] }
 0x15d   : > { %502 = vst [vmem:[%s1506_s15 + $0x3c8] sm:$0xff] %v2305_v13  ;;  %v2359_v13 = vld [vmem:[#allocation123_spill] sm:$0xff] }
 0x15e   : > { %503 = vst [vmem:[%s1506_s15 + $0x3d0] sm:$0xff] %v2306_v14  ;;  %v2360_v14 = vld [vmem:[#allocation124_spill] sm:$0xff] }
 0x15f   : > { %504 = vst [vmem:[%s1506_s15 + $0x3d8] sm:$0xff] %v2307_v15  ;;  %v2361_v15 = vld [vmem:[#allocation125_spill] sm:$0xff] }
 0x160   : > { %505 = vst [vmem:[%s1506_s15 + $0x3e0] sm:$0xff] %v2308_v16  ;;  %v2362_v16 = vld [vmem:[#allocation126_spill] sm:$0xff] }
 0x161   : > { %506 = vst [vmem:[%s1506_s15 + $0x3e8] sm:$0xff] %v2309_v17  ;;  %v2363_v17 = vld [vmem:[#allocation127_spill] sm:$0xff] }
 0x162   : > { %507 = vst [vmem:[%s1506_s15 + $0x3f0] sm:$0xff] %v2310_v18  ;;  %v2364_v18 = vld [vmem:[#allocation128_spill] sm:$0xff] }
 0x163   : > { %508 = vst [vmem:[%s1506_s15 + $0x3f8] sm:$0xff] %v2311_v19  ;;  %v2365_v19 = vld [vmem:[#allocation129_spill] sm:$0xff] }
 0x164   : > { %509 = vst [vmem:[%s1506_s15 + $0x400] sm:$0xff] %v2312_v20  ;;  %v2366_v20 = vld [vmem:[#allocation130_spill] sm:$0xff] }
 0x165   : > { %510 = vst [vmem:[%s1506_s15 + $0x408] sm:$0xff] %v2313_v21  ;;  %v2367_v21 = vld [vmem:[#allocation131_spill] sm:$0xff] }
 0x166   : > { %511 = vst [vmem:[%s1506_s15 + $0x410] sm:$0xff] %v2314_v22  ;;  %v2368_v22 = vld [vmem:[#allocation132_spill] sm:$0xff] }
 0x167   : > { %512 = vst [vmem:[%s1506_s15 + $0x418] sm:$0xff] %v2315_v23  ;;  %v2369_v23 = vld [vmem:[#allocation133_spill] sm:$0xff] }
 0x168   : > { %513 = vst [vmem:[%s1506_s15 + $0x420] sm:$0xff] %v2316_v24  ;;  %v2370_v24 = vld [vmem:[#allocation134_spill] sm:$0xff] }
 0x169   : > { %514 = vst [vmem:[%s1506_s15 + $0x428] sm:$0xff] %v2317_v25  ;;  %v2371_v25 = vld [vmem:[#allocation135_spill] sm:$0xff] }
 0x16a   : > { %515 = vst [vmem:[%s1506_s15 + $0x430] sm:$0xff] %v2318_v26  ;;  %v2372_v26 = vld [vmem:[#allocation136_spill] sm:$0xff] }
 0x16b   : > { %516 = vst [vmem:[%s1506_s15 + $0x438] sm:$0xff] %v2319_v27  ;;  %v2373_v27 = vld [vmem:[#allocation137_spill] sm:$0xff] }
 0x16c   : > { %517 = vst [vmem:[%s1506_s15 + $0x440] sm:$0xff] %v2320_v28  ;;  %v2374_v28 = vld [vmem:[#allocation138_spill] sm:$0xff] }
 0x16d   : > { %518 = vst [vmem:[%s1506_s15 + $0x448] sm:$0xff] %v2321_v29  ;;  %v2375_v29 = vld [vmem:[#allocation139_spill] sm:$0xff] }
 0x16e   : > { %519 = vst [vmem:[%s1506_s15 + $0x450] sm:$0xff] %v2322_v30  ;;  %v2376_v30 = vld [vmem:[#allocation140_spill] sm:$0xff] }
 0x16f   : > { %520 = vst [vmem:[%s1506_s15 + $0x458] sm:$0xff] %v2323_v31  ;;  %v2377_v31 = vld [vmem:[#allocation141_spill] sm:$0xff] }
 0x170   : > { %521 = vst [vmem:[%s1506_s15 + $0x460] sm:$0xff] %v2324_v32  ;;  %v2378_v32 = vld [vmem:[#allocation142_spill] sm:$0xff] }
 0x171   : > { %522 = vst [vmem:[%s1506_s15 + $0x468] sm:$0xff] %v2325_v33  ;;  %v2379_v33 = vld [vmem:[#allocation143_spill] sm:$0xff] }
 0x172   : > { %523 = vst [vmem:[%s1506_s15 + $0x470] sm:$0xff] %v2326_v34  ;;  %v2380_v34 = vld [vmem:[#allocation144_spill] sm:$0xff] }
 0x173   : > { %524 = vst [vmem:[%s1506_s15 + $0x478] sm:$0xff] %v2327_v35  ;;  %v2381_v35 = vld [vmem:[#allocation145_spill] sm:$0xff] }
 0x174   : > { %525 = vst [vmem:[%s1506_s15 + $0x480] sm:$0xff] %v2328_v36  ;;  %v2382_v36 = vld [vmem:[#allocation146_spill] sm:$0xff] }
 0x175   : > { %526 = vst [vmem:[%s1506_s15 + $0x488] sm:$0xff] %v2329_v37  ;;  %v2383_v37 = vld [vmem:[#allocation147_spill] sm:$0xff] }
 0x176   : > { %527 = vst [vmem:[%s1506_s15 + $0x490] sm:$0xff] %v2330_v38  ;;  %v2384_v38 = vld [vmem:[#allocation148_spill] sm:$0xff] }
 0x177   : > { %528 = vst [vmem:[%s1506_s15 + $0x498] sm:$0xff] %v2331_v39  ;;  %v2385_v39 = vld [vmem:[#allocation149_spill] sm:$0xff] }
 0x178   : > { %529 = vst [vmem:[%s1506_s15 + $0x4a0] sm:$0xff] %v2332_v40  ;;  %v2386_v40 = vld [vmem:[#allocation150_spill] sm:$0xff] }
 0x179   : > { %530 = vst [vmem:[%s1506_s15 + $0x4a8] sm:$0xff] %v2333_v41  ;;  %v2387_v41 = vld [vmem:[#allocation151_spill] sm:$0xff] }
 0x17a   : > { %531 = vst [vmem:[%s1506_s15 + $0x4b0] sm:$0xff] %v2334_v42  ;;  %v2388_v42 = vld [vmem:[#allocation152_spill] sm:$0xff] }
 0x17b   : > { %532 = vst [vmem:[%s1506_s15 + $0x4b8] sm:$0xff] %v2335_v43  ;;  %v2389_v43 = vld [vmem:[#allocation153_spill] sm:$0xff] }
 0x17c   : > { %533 = vst [vmem:[%s1506_s15 + $0x4c0] sm:$0xff] %v2336_v44  ;;  %v2390_v44 = vld [vmem:[#allocation154_spill] sm:$0xff] }
 0x17d   : > { %534 = vst [vmem:[%s1506_s15 + $0x4c8] sm:$0xff] %v2337_v45  ;;  %v2391_v45 = vld [vmem:[#allocation155_spill] sm:$0xff] }
 0x17e   : > { %535 = vst [vmem:[%s1506_s15 + $0x4d0] sm:$0xff] %v2338_v46  ;;  %v2392_v46 = vld [vmem:[#allocation156_spill] sm:$0xff] }
 0x17f   : > { %536 = vst [vmem:[%s1506_s15 + $0x4d8] sm:$0xff] %v2339_v47  ;;  %v2393_v47 = vld [vmem:[#allocation157_spill] sm:$0xff] }
 0x180   : > { %537 = vst [vmem:[%s1506_s15 + $0x4e0] sm:$0xff] %v2340_v48  ;;  %v2394_v48 = vld [vmem:[#allocation158_spill] sm:$0xff] }
 0x181   : > { %538 = vst [vmem:[%s1506_s15 + $0x4e8] sm:$0xff] %v2341_v49  ;;  %v2395_v49 = vld [vmem:[#allocation159_spill] sm:$0xff] }
 0x182   : > { %539 = vst [vmem:[%s1506_s15 + $0x4f0] sm:$0xff] %v2342_v50  ;;  %v2396_v50 = vld [vmem:[#allocation160_spill] sm:$0xff] }
 0x183   : > { %540 = vst [vmem:[%s1506_s15 + $0x4f8] sm:$0xff] %v2343_v51  ;;  %v2397_v51 = vld [vmem:[#allocation161_spill] sm:$0xff] }
 0x184   : > { %541 = vst [vmem:[%s1506_s15 + $0x500] sm:$0xff] %v2344_v52  ;;  %v2398_v52 = vld [vmem:[#allocation162_spill] sm:$0xff] }
 0x185   : > { %542 = vst [vmem:[%s1506_s15 + $0x508] sm:$0xff] %v2345_v53  ;;  %v2399_v53 = vld [vmem:[#allocation163_spill] sm:$0xff] }
 0x186   : > { %543 = vst [vmem:[%s1506_s15 + $0x510] sm:$0xff] %v2346_v0  ;;  %v2400_v0 = vld [vmem:[#allocation164_spill] sm:$0xff] }
 0x187   : > { %544 = vst [vmem:[%s1506_s15 + $0x518] sm:$0xff] %v2347_v1  ;;  %v2401_v1 = vld [vmem:[#allocation165_spill] sm:$0xff] }
 0x188   : > { %545 = vst [vmem:[%s1506_s15 + $0x520] sm:$0xff] %v2348_v2  ;;  %v2402_v2 = vld [vmem:[#allocation166_spill] sm:$0xff] }
 0x189   : > { %546 = vst [vmem:[%s1506_s15 + $0x528] sm:$0xff] %v2349_v3  ;;  %v2403_v3 = vld [vmem:[#allocation167_spill] sm:$0xff] }
 0x18a   : > { %547 = vst [vmem:[%s1506_s15 + $0x530] sm:$0xff] %v2350_v4  ;;  %v2404_v4 = vld [vmem:[#allocation168_spill] sm:$0xff] }
 0x18b   : > { %548 = vst [vmem:[%s1506_s15 + $0x538] sm:$0xff] %v2351_v5  ;;  %v2405_v5 = vld [vmem:[#allocation169_spill] sm:$0xff] }
 0x18c   : > { %549 = vst [vmem:[%s1506_s15 + $0x540] sm:$0xff] %v2352_v6  ;;  %v2406_v6 = vld [vmem:[#allocation170_spill] sm:$0xff] }
 0x18d   : > { %550 = vst [vmem:[%s1506_s15 + $0x548] sm:$0xff] %v2353_v7  ;;  %v2407_v7 = vld [vmem:[#allocation171_spill] sm:$0xff] }
 0x18e   : > { %551 = vst [vmem:[%s1506_s15 + $0x550] sm:$0xff] %v2354_v8  ;;  %v2408_v8 = vld [vmem:[#allocation172_spill] sm:$0xff] }
 0x18f   : > { %552 = vst [vmem:[%s1506_s15 + $0x558] sm:$0xff] %v2355_v9  ;;  %v2409_v9 = vld [vmem:[#allocation173_spill] sm:$0xff] }
 0x190   : > { %553 = vst [vmem:[%s1506_s15 + $0x560] sm:$0xff] %v2356_v10  ;;  %v2410_v10 = vld [vmem:[#allocation174_spill] sm:$0xff] }
 0x191   : > { %554 = vst [vmem:[%s1506_s15 + $0x568] sm:$0xff] %v2357_v11  ;;  %v2411_v11 = vld [vmem:[#allocation175_spill] sm:$0xff] }
 0x192   : > { %555 = vst [vmem:[%s1506_s15 + $0x570] sm:$0xff] %v2358_v12  ;;  %v2412_v12 = vld [vmem:[#allocation176_spill] sm:$0xff] }
 0x193   : > { %556 = vst [vmem:[%s1506_s15 + $0x578] sm:$0xff] %v2359_v13  ;;  %v2413_v13 = vld [vmem:[#allocation177_spill] sm:$0xff] }
 0x194   : > { %557 = vst [vmem:[%s1506_s15 + $0x580] sm:$0xff] %v2360_v14  ;;  %v2414_v14 = vld [vmem:[#allocation178_spill] sm:$0xff] }
 0x195   : > { %558 = vst [vmem:[%s1506_s15 + $0x588] sm:$0xff] %v2361_v15  ;;  %v2415_v15 = vld [vmem:[#allocation179_spill] sm:$0xff] }
 0x196   : > { %559 = vst [vmem:[%s1506_s15 + $0x590] sm:$0xff] %v2362_v16  ;;  %v2416_v16 = vld [vmem:[#allocation180_spill] sm:$0xff] }
 0x197   : > { %560 = vst [vmem:[%s1506_s15 + $0x598] sm:$0xff] %v2363_v17  ;;  %v2417_v17 = vld [vmem:[#allocation181_spill] sm:$0xff] }
 0x198   : > { %561 = vst [vmem:[%s1506_s15 + $0x5a0] sm:$0xff] %v2364_v18  ;;  %v2418_v18 = vld [vmem:[#allocation182_spill] sm:$0xff] }
 0x199   : > { %562 = vst [vmem:[%s1506_s15 + $0x5a8] sm:$0xff] %v2365_v19  ;;  %v2419_v19 = vld [vmem:[#allocation183_spill] sm:$0xff] }
 0x19a   : > { %563 = vst [vmem:[%s1506_s15 + $0x5b0] sm:$0xff] %v2366_v20  ;;  %v2420_v20 = vld [vmem:[#allocation184_spill] sm:$0xff] }
 0x19b   : > { %564 = vst [vmem:[%s1506_s15 + $0x5b8] sm:$0xff] %v2367_v21  ;;  %v2421_v21 = vld [vmem:[#allocation185_spill] sm:$0xff] }
 0x19c   : > { %565 = vst [vmem:[%s1506_s15 + $0x5c0] sm:$0xff] %v2368_v22  ;;  %v2422_v22 = vld [vmem:[#allocation186_spill] sm:$0xff] }
 0x19d   : > { %566 = vst [vmem:[%s1506_s15 + $0x5c8] sm:$0xff] %v2369_v23  ;;  %v2423_v23 = vld [vmem:[#allocation187_spill] sm:$0xff] }
 0x19e   : > { %567 = vst [vmem:[%s1506_s15 + $0x5d0] sm:$0xff] %v2370_v24  ;;  %v2424_v24 = vld [vmem:[#allocation188_spill] sm:$0xff] }
 0x19f   : > { %568 = vst [vmem:[%s1506_s15 + $0x5d8] sm:$0xff] %v2371_v25  ;;  %v2425_v25 = vld [vmem:[#allocation189_spill] sm:$0xff] }
 0x1a0   : > { %569 = vst [vmem:[%s1506_s15 + $0x5e0] sm:$0xff] %v2372_v26  ;;  %v2426_v26 = vld [vmem:[#allocation190_spill] sm:$0xff] }
 0x1a1   : > { %570 = vst [vmem:[%s1506_s15 + $0x5e8] sm:$0xff] %v2373_v27  ;;  %v2427_v27 = vld [vmem:[#allocation191_spill] sm:$0xff] }
 0x1a2   : > { %571 = vst [vmem:[%s1506_s15 + $0x5f0] sm:$0xff] %v2374_v28  ;;  %v2428_v28 = vld [vmem:[#allocation192_spill] sm:$0xff] }
 0x1a3   : > { %572 = vst [vmem:[%s1506_s15 + $0x5f8] sm:$0xff] %v2375_v29  ;;  %v2429_v29 = vld [vmem:[#allocation193_spill] sm:$0xff] }
 0x1a4   : > { %573 = vst [vmem:[%s1506_s15 + $0x600] sm:$0xff] %v2376_v30 }
 0x1a5   : > { %574 = vst [vmem:[%s1506_s15 + $0x608] sm:$0xff] %v2377_v31 }
 0x1a6   : > { %575 = vst [vmem:[%s1506_s15 + $0x610] sm:$0xff] %v2378_v32 }
 0x1a7   : > { %576 = vst [vmem:[%s1506_s15 + $0x618] sm:$0xff] %v2379_v33 }
 0x1a8   : > { %577 = vst [vmem:[%s1506_s15 + $0x620] sm:$0xff] %v2380_v34 }
 0x1a9   : > { %578 = vst [vmem:[%s1506_s15 + $0x628] sm:$0xff] %v2381_v35 }
 0x1aa   : > { %579 = vst [vmem:[%s1506_s15 + $0x630] sm:$0xff] %v2382_v36 }
 0x1ab   : > { %580 = vst [vmem:[%s1506_s15 + $0x638] sm:$0xff] %v2383_v37 }
 0x1ac   : > { %581 = vst [vmem:[%s1506_s15 + $0x640] sm:$0xff] %v2384_v38 }
 0x1ad   : > { %582 = vst [vmem:[%s1506_s15 + $0x648] sm:$0xff] %v2385_v39 }
 0x1ae   : > { %583 = vst [vmem:[%s1506_s15 + $0x650] sm:$0xff] %v2386_v40 }
 0x1af   : > { %584 = vst [vmem:[%s1506_s15 + $0x658] sm:$0xff] %v2387_v41 }
 0x1b0   : > { %585 = vst [vmem:[%s1506_s15 + $0x660] sm:$0xff] %v2388_v42 }
 0x1b1   : > { %586 = vst [vmem:[%s1506_s15 + $0x668] sm:$0xff] %v2389_v43 }
 0x1b2   : > { %587 = vst [vmem:[%s1506_s15 + $0x670] sm:$0xff] %v2390_v44 }
 0x1b3   : > { %588 = vst [vmem:[%s1506_s15 + $0x678] sm:$0xff] %v2391_v45 }
 0x1b4   : > { %589 = vst [vmem:[%s1506_s15 + $0x680] sm:$0xff] %v2392_v46 }
 0x1b5   : > { %590 = vst [vmem:[%s1506_s15 + $0x688] sm:$0xff] %v2393_v47 }
 0x1b6   : > { %591 = vst [vmem:[%s1506_s15 + $0x690] sm:$0xff] %v2394_v48 }
 0x1b7   : > { %592 = vst [vmem:[%s1506_s15 + $0x698] sm:$0xff] %v2395_v49 }
 0x1b8   : > { %593 = vst [vmem:[%s1506_s15 + $0x6a0] sm:$0xff] %v2396_v50 }
 0x1b9   : > { %594 = vst [vmem:[%s1506_s15 + $0x6a8] sm:$0xff] %v2397_v51 }
 0x1ba   : > { %595 = vst [vmem:[%s1506_s15 + $0x6b0] sm:$0xff] %v2398_v52 }
 0x1bb   : > { %596 = vst [vmem:[%s1506_s15 + $0x6b8] sm:$0xff] %v2399_v53 }
 0x1bc   : > { %597 = vst [vmem:[%s1506_s15 + $0x6c0] sm:$0xff] %v2400_v0 }
 0x1bd   : > { %598 = vst [vmem:[%s1506_s15 + $0x6c8] sm:$0xff] %v2401_v1 }
 0x1be   : > { %599 = vst [vmem:[%s1506_s15 + $0x6d0] sm:$0xff] %v2402_v2 }
 0x1bf   : > { %600 = vst [vmem:[%s1506_s15 + $0x6d8] sm:$0xff] %v2403_v3 }
 0x1c0   : > { %601 = vst [vmem:[%s1506_s15 + $0x6e0] sm:$0xff] %v2404_v4 }
 0x1c1   : > { %602 = vst [vmem:[%s1506_s15 + $0x6e8] sm:$0xff] %v2405_v5 }
 0x1c2   : > { %603 = vst [vmem:[%s1506_s15 + $0x6f0] sm:$0xff] %v2406_v6 }
 0x1c3   : > { %604 = vst [vmem:[%s1506_s15 + $0x6f8] sm:$0xff] %v2407_v7 }
 0x1c4   : > { %605 = vst [vmem:[%s1506_s15 + $0x700] sm:$0xff] %v2408_v8 }
 0x1c5   : > { %606 = vst [vmem:[%s1506_s15 + $0x708] sm:$0xff] %v2409_v9 }
 0x1c6   : > { %607 = vst [vmem:[%s1506_s15 + $0x710] sm:$0xff] %v2410_v10 }
 0x1c7   : > { %608 = vst [vmem:[%s1506_s15 + $0x718] sm:$0xff] %v2411_v11 }
 0x1c8   : > { %609 = vst [vmem:[%s1506_s15 + $0x720] sm:$0xff] %v2412_v12 }
 0x1c9   : > { %610 = vst [vmem:[%s1506_s15 + $0x728] sm:$0xff] %v2413_v13 }
 0x1ca   : > { %611 = vst [vmem:[%s1506_s15 + $0x730] sm:$0xff] %v2414_v14 }
 0x1cb   : > { %612 = vst [vmem:[%s1506_s15 + $0x738] sm:$0xff] %v2415_v15 }
 0x1cc   : > { %613 = vst [vmem:[%s1506_s15 + $0x740] sm:$0xff] %v2416_v16 }
 0x1cd   : > { %614 = vst [vmem:[%s1506_s15 + $0x748] sm:$0xff] %v2417_v17 }
 0x1ce   : > { %615 = vst [vmem:[%s1506_s15 + $0x750] sm:$0xff] %v2418_v18 }
 0x1cf   : > { %616 = vst [vmem:[%s1506_s15 + $0x758] sm:$0xff] %v2419_v19 }
 0x1d0   : > { %617 = vst [vmem:[%s1506_s15 + $0x760] sm:$0xff] %v2420_v20 }
 0x1d1   : > { %618 = vst [vmem:[%s1506_s15 + $0x768] sm:$0xff] %v2421_v21 }
 0x1d2   : > { %619 = vst [vmem:[%s1506_s15 + $0x770] sm:$0xff] %v2422_v22 }
 0x1d3   : > { %620 = vst [vmem:[%s1506_s15 + $0x778] sm:$0xff] %v1472_v57 }
 0x1d4   : > { %621 = vst [vmem:[%s1506_s15 + $0x780] sm:$0xff] %v1475_v58 }
 0x1d5   : > { %622 = vst [vmem:[%s1506_s15 + $0x788] sm:$0xff] %v1478_v59 }
 0x1d6   : > { %623 = vst [vmem:[%s1506_s15 + $0x790] sm:$0xff] %v2423_v23 }
 0x1d7   : > { %624 = vst [vmem:[%s1506_s15 + $0x798] sm:$0xff] %v2424_v24 }
 0x1d8   : > { %625 = vst [vmem:[%s1506_s15 + $0x7a0] sm:$0xff] %v2425_v25 }
 0x1d9   : > { %626 = vst [vmem:[%s1506_s15 + $0x7a8] sm:$0xff] %v2426_v26 }
 0x1da   : > { %627 = vst [vmem:[%s1506_s15 + $0x7b0] sm:$0xff] %v2427_v27 }
 0x1db   : > { %628 = vst [vmem:[%s1506_s15 + $0x7b8] sm:$0xff] %v2428_v28 }
 0x1dc   : > { %629 = vst [vmem:[%s1506_s15 + $0x7c0] sm:$0xff] %v2429_v29 }
 0x1dd   : > { %630 = vst [vmem:[%s1506_s15 + $0x7c8] sm:$0xff] %v1509_v62 }
 0x1de   : > { %631 = vst [vmem:[%s1506_s15 + $0x7d0] sm:$0xff] %v1512_v63 }
 0x1df   : > { %632 = vst [vmem:[%s1506_s15 + $0x7d8] sm:$0xff] %v1515_v54 }
 0x1e0   : > { %633 = vst [vmem:[%s1506_s15 + $0x7e0] sm:$0xff] %v1518_v55 }
 0x1e1   : > { %634 = vst [vmem:[%s1506_s15 + $0x7e8] sm:$0xff] %v1521_v61 }
 0x1e2   : > { %635 = vst [vmem:[%s1506_s15 + $0x7f0] sm:$0xff] %v1524_v60 }
 0x1e3   : > { %636 = vst [vmem:[%s1506_s15 + $0x7f8] sm:$0xff] %v1527_v56 }
 0x1e4 PF: > { %s11_s6 = sadd.s32 1, %s724_s6  }
 0x1e5   : > { %p8_p4 = scmp.ge.s32.totalorder %s11_s6, 10  }
 0x1e7   :  { %10 = sbr.rel (!%p8_p4) target bundleno = 1 (0x1), region = 54 }

</bundles_post_ra>
